<compile_context>
chip_gen: v7x
topology: tpu7x:2x2x1
jax: 0.10.0
libtpu: 0.0.40
codegen_flags: <defaults>
</compile_context>

<pallas_src>
import numpy as np
import jax
import jax.numpy as jnp
from jax.experimental import pallas as pl
from jax.experimental.pallas import tpu as pltpu

BN_EPS = 1e-5

# (c_in, c_out, kernel_size) per conv layer; conv stride = 2, then MaxPool1d(2).
LAYER_CFG = ((2, 128, 5), (128, 128, 5), (128, 64, 3), (64, 32, 2))
FC3_PAD = 128        # fc3 logits padded to a full lane width
CONV1_KPAD = 16      # conv1 im2col contraction (k*c_in = 10) padded to 16


def _round_up(v, m):
    return (v + m - 1) // m * m


def _plan(length):
    """Static per-layer geometry: conv stride 2 + MaxPool1d(2), rows padded to 8."""
    plan, t = [], length
    for c_in, c_out, k in LAYER_CFG:
        t_conv = (t - k) // 2 + 1
        t_pool = t_conv // 2
        plan.append(dict(c_in=c_in, c_out=c_out, k=k, t_in=t, t_pool=t_pool,
                         tp_pad=_round_up(max(t_pool, 1), 8)))
        t = t_pool
    # Activation-scratch row allocation: large enough that the NEXT layer's
    # stride-4 tap reads at *padded* pool positions stay in-bounds.
    for li in range(len(plan) - 1):
        nxt = plan[li + 1]
        need = 4 * (nxt["tp_pad"] - 1) + nxt["k"] + 2
        plan[li]["alloc"] = _round_up(max(plan[li]["t_pool"], need), 8)
    return plan


def _conv1_im2col(x, p1):
    """Lane-dense, phase-stacked conv1 im2col built with plain XLA ops.

    Returns (2, B, tp_pad, CONV1_KPAD) bf16 with
      out[ph, b, p, j*c_in + c] = x[b, 4p + 2*ph + j, c]   (zero past the end).
    Pool position p covers conv positions 2p (even phase) and 2p+1 (odd).
    """
    b, length, c_in = x.shape
    k, tp_pad = p1["k"], p1["tp_pad"]
    need = 4 * tp_pad + k + 1
    if need > length:
        x = jnp.pad(x, ((0, 0), (0, need - length), (0, 0)))
    phases = []
    for ph in range(2):
        taps = [x[:, 2 * ph + j: 2 * ph + j + 4 * tp_pad: 4, :] for j in range(k)]
        phases.append(jnp.concatenate(taps, axis=-1))        # (B, tp_pad, k*c_in)
    im = jnp.stack(phases, axis=0)                            # (2, B, tp_pad, k*c_in)
    im = jnp.pad(im, ((0, 0), (0, 0), (0, 0), (0, CONV1_KPAD - k * c_in)))
    return im.astype(jnp.bfloat16)


# ----------------------------------------------------------------------------
# Forward pass (single fused pallas_call)
# ----------------------------------------------------------------------------
def detection_model_forward(prepped, x):
    """Equivalent of detectionModel.forward in eval mode.

    x: (B, L, 2) float32 channels-last (what the PyTorch forward receives
    before its own permute).  Returns (B, 7) sigmoid probabilities.
    dropout1/dropout2 are eval-mode identities.
    """
    batch, length, _ = x.shape
    plan = _plan(length)
    assert plan[-1]["t_pool"] >= 1, "input length too short for the conv stack"
    p1, p2, p3, p4 = plan

    # MXU contraction-chunk size: 256 on v6e/v7x, 128 on v5-family.
    try:
        k_elems = 128 if "v5" in jax.devices()[0].device_kind.lower() else 256
    except Exception:  # pragma: no cover - conservative fallback
        k_elems = 256

    im1 = _conv1_im2col(x, p1)

    def kernel(im1_ref, w1, b1, w2, b2, w3, b3, w4, b4,
               wf1, bf1, wf2, bf2, wf3, bf3, out_ref, a1, a2, a3):
        act = (a1, a2, a3)

        # Zero scratch rows beyond the written range (touched only by the next
        # layer's padded-position tap reads; never feeds real outputs).
        for ref, p in zip(act, plan[:-1]):
            if p["alloc"] > p["tp_pad"]:
                ref[:, p["tp_pad"]:p["alloc"], :] = jnp.zeros(
                    (batch, p["alloc"] - p["tp_pad"], p["c_out"]), jnp.float32)

        def pool_bias_relu(y, rows, b_ref):
            # Even/odd phase max (sublane-aligned split), folded-BN bias, ReLU.
            # max(relu(a+b'), relu(c+b')) == relu(max(a, c) + b').
            return jnp.maximum(jnp.maximum(y[:rows], y[rows:]) + b_ref[...], 0.0)

        # ---- conv1: wrapper-built im2col, row-chunked single MXU dots -------
        w1v = w1[...]
        for p0 in range(0, p1["tp_pad"], 32):
            pc = min(32, p1["tp_pad"] - p0)
            rows = batch * pc
            even = im1_ref[0, :, p0:p0 + pc, :].reshape(rows, CONV1_KPAD)
            odd = im1_ref[1, :, p0:p0 + pc, :].reshape(rows, CONV1_KPAD)
            lhs = jnp.concatenate([even, odd], axis=0)         # (2*rows, 16) bf16
            y = jnp.dot(lhs, w1v, preferred_element_type=jnp.float32)
            a1[:, p0:p0 + pc, :] = pool_bias_relu(y, rows, b1).reshape(
                batch, pc, p1["c_out"])

        # ---- conv2..conv4: in-kernel im2col (stride-4 taps), K-packed dots --
        def conv_layer(h_ref, w_ref, b_ref, p):
            k, cin, cout, tp = p["k"], p["c_in"], p["c_out"], p["tp_pad"]
            rows = batch * tp
            tpg = max(1, k_elems // cin)                       # taps per K chunk
            acc = None
            for g0 in range(0, k, tpg):
                grp = list(range(g0, min(g0 + tpg, k)))
                parts = []
                for ph in (0, 2):                              # even / odd phase
                    cols = [h_ref[:, pl.ds(j + ph, tp, 4), :]
                            .reshape(rows, cin).astype(jnp.bfloat16)
                            for j in grp]
                    parts.append(cols[0] if len(cols) == 1
                                 else jnp.concatenate(cols, axis=-1))
                lhs = jnp.concatenate(parts, axis=0)           # (2*rows, Kc) bf16
                part = jnp.dot(lhs, w_ref[grp[0] * cin:(grp[-1] + 1) * cin, :],
                               preferred_element_type=jnp.float32)
                acc = part if acc is None else acc + part
            return pool_bias_relu(acc, rows, b_ref)            # (rows, cout) f32

        y2 = conv_layer(a1, w2, b2, p2)
        a2[:, :p2["tp_pad"], :] = y2.reshape(batch, p2["tp_pad"], p2["c_out"])
        y3 = conv_layer(a2, w3, b3, p3)
        a3[:, :p3["tp_pad"], :] = y3.reshape(batch, p3["tp_pad"], p3["c_out"])
        y4 = conv_layer(a3, w4, b4, p4)

        # AdaptiveAvgPool1d(1) over the real positions + flatten (dropout = id).
        feat = jnp.mean(
            y4.reshape(batch, p4["tp_pad"], p4["c_out"])[:, :p4["t_pool"], :],
            axis=1)

        h = jnp.maximum(jnp.dot(feat, wf1[...], preferred_element_type=jnp.float32)
                        + bf1[...], 0.0)
        h = jnp.maximum(jnp.dot(h, wf2[...], preferred_element_type=jnp.float32)
                        + bf2[...], 0.0)
        z = jnp.dot(h, wf3[...], preferred_element_type=jnp.float32) + bf3[...]
        out_ref[...] = pl.reciprocal(1.0 + jnp.exp(-z), approx=True)   # sigmoid

    vmem = pl.BlockSpec(memory_space=pltpu.MemorySpace.VMEM)
    scratch = [pltpu.VMEM((batch, p["alloc"], p["c_out"]), jnp.float32)
               for p in plan[:-1]]

    # TODO(synk): at much larger batch, add a grid axis over batch with
    # dimension_semantics=("parallel",) so v7x's two TensorCores split the work.
    out_padded = pl.pallas_call(
        kernel,
        out_shape=jax.ShapeDtypeStruct((batch, FC3_PAD), jnp.float32),
        in_specs=[vmem] * 15,
        out_specs=vmem,
        scratch_shapes=scratch,
    )(im1,
      prepped["w1"], prepped["b1"], prepped["w2"], prepped["b2"],
      prepped["w3"], prepped["b3"], prepped["w4"], prepped["b4"],
      prepped["w_fc1"], prepped["b_fc1"], prepped["w_fc2"], prepped["b_fc2"],
      prepped["w_fc3"], prepped["b_fc3"])
    return out_padded[:, :7]                     # drop lane padding of fc3


# ----------------------------------------------------------------------------
# Parameters (PyTorch layouts) + prep (BN fold, layout remap, bf16, padding)
# ----------------------------------------------------------------------------
def init_params(key):
    """Deterministic synthetic parameters in PyTorch layouts."""
    ks = iter(jax.random.split(key, 32))
    p = {}

    def conv(c_in, c_out, k):
        w = jax.random.normal(next(ks), (c_out, c_in, k), jnp.float32)
        w = w / np.sqrt(c_in * k)
        b = 0.05 * jax.random.normal(next(ks), (c_out,), jnp.float32)
        return w, b

    def bn(c):
        gamma = 1.0 + 0.1 * jax.random.normal(next(ks), (c,), jnp.float32)
        beta = 0.1 * jax.random.normal(next(ks), (c,), jnp.float32)
        mean = 0.1 * jax.random.normal(next(ks), (c,), jnp.float32)
        var = 1.0 + 0.1 * jnp.abs(jax.random.normal(next(ks), (c,), jnp.float32))
        return gamma, beta, mean, var

    def fc(c_in, c_out):
        w = jax.random.normal(next(ks), (c_out, c_in), jnp.float32) / np.sqrt(c_in)
        b = 0.05 * jax.random.normal(next(ks), (c_out,), jnp.float32)
        return w, b

    for i, (c_in, c_out, k) in enumerate(LAYER_CFG, start=1):
        p[f"conv{i}"] = conv(c_in, c_out, k)
        p[f"bn{i}"] = bn(c_out)
    p["fc1"], p["fc2"], p["fc3"] = fc(32, 128), fc(128, 64), fc(64, 7)
    return p


def prepare_params(p):
    """Fold eval-mode BN (+ conv bias) into conv weights and remap layouts."""
    out = {}
    for i, (c_in, c_out, k) in enumerate(LAYER_CFG, start=1):
        w, b = p[f"conv{i}"]                     # (c_out, c_in, k), (c_out,)
        gamma, beta, mean, var = p[f"bn{i}"]
        scale = gamma * jax.lax.rsqrt(var + BN_EPS)
        w_fold = w * scale[:, None, None]
        b_fold = (b - mean) * scale + beta
        # rows ordered (tap k-major, c_in-minor) to match the im2col layout.
        w_mat = jnp.transpose(w_fold, (2, 1, 0)).reshape(k * c_in, c_out)
        if i == 1:
            w_mat = jnp.pad(w_mat, ((0, CONV1_KPAD - k * c_in), (0, 0)))
        out[f"w{i}"] = w_mat.astype(jnp.bfloat16)
        out[f"b{i}"] = b_fold.reshape(1, c_out)
    for name in ("fc1", "fc2"):
        w, b = p[name]                           # (c_out, c_in), (c_out,)
        out[f"w_{name}"] = jnp.transpose(w)
        out[f"b_{name}"] = b.reshape(1, -1)
    w3, b3 = p["fc3"]                            # (7, 64), (7,)
    out["w_fc3"] = jnp.zeros((w3.shape[1], FC3_PAD),
                             jnp.float32).at[:, :w3.shape[0]].set(jnp.transpose(w3))
    out["b_fc3"] = jnp.zeros((1, FC3_PAD), jnp.float32).at[0, :w3.shape[0]].set(b3)
    return out


# ----------------------------------------------------------------------------
# Pure-JAX f32 reference (mirrors the PyTorch forward) for validation
# ----------------------------------------------------------------------------
def reference_forward(p, x):
    h = jnp.transpose(x, (0, 2, 1))              # (B, C, L), like permute(0,2,1)
    for i in range(1, 5):
        w, b = p[f"conv{i}"]
        gamma, beta, mean, var = p[f"bn{i}"]
        h = jax.lax.conv_general_dilated(h, w, window_strides=(2,), padding="VALID",
                                         dimension_numbers=("NCH", "OIH", "NCH"))
        h = h + b[None, :, None]
        h = (h - mean[None, :, None]) * jax.lax.rsqrt(var[None, :, None] + BN_EPS)
        h = gamma[None, :, None] * h + beta[None, :, None]
        h = jnp.maximum(h, 0.0)
        t = h.shape[-1] // 2
        h = jnp.max(h[:, :, :2 * t].reshape(h.shape[0], h.shape[1], t, 2), axis=-1)
    h = jnp.mean(h, axis=-1)                     # AdaptiveAvgPool1d(1) + flatten
    for name in ("fc1", "fc2"):
        w, b = p[name]
        h = jnp.maximum(h @ w.T + b, 0.0)
    w, b = p["fc3"]
    return jax.nn.sigmoid(h @ w.T + b)


if __name__ == "__main__":
    key = jax.random.PRNGKey(0)
    k_param, k_x = jax.random.split(key)
    params = init_params(k_param)
    prepped = prepare_params(params)

    # L=512 survives all four conv(stride 2)+pool(2) stages: 512->127->31->7->1.
    B, L, C_IN = 2, 512, 2
    x = jax.random.normal(k_x, (B, L, C_IN), jnp.float32)

    fwd = jax.jit(detection_model_forward)
    y = jax.block_until_ready(fwd(prepped, x))
    assert y.shape == (B, 7)
    assert bool(jnp.all(jnp.isfinite(y)))
    assert bool(jnp.all((y >= 0.0) & (y <= 1.0)))

    # Cross-check against the pure-XLA f32 reference (bf16 MXU operands in the
    # kernel -> allow a small tolerance).
    y_ref = jax.block_until_ready(jax.jit(reference_forward)(params, x))
    max_err = float(jnp.max(jnp.abs(y - y_ref)))
    assert max_err < 5e-2, f"mismatch vs reference: max_err={max_err}"
    print("KERNEL_OK")
</pallas_src>

<mosaic_0001>
module attributes {stable_mosaic.version = 11 : i64} {
  func.func @kernel(%arg0: memref<2x2x128x16xbf16, #tpu.memory_space<vmem>>, %arg1: memref<16x128xbf16, #tpu.memory_space<vmem>>, %arg2: memref<1x128xf32, #tpu.memory_space<vmem>>, %arg3: memref<640x128xbf16, #tpu.memory_space<vmem>>, %arg4: memref<1x128xf32, #tpu.memory_space<vmem>>, %arg5: memref<384x64xbf16, #tpu.memory_space<vmem>>, %arg6: memref<1x64xf32, #tpu.memory_space<vmem>>, %arg7: memref<128x32xbf16, #tpu.memory_space<vmem>>, %arg8: memref<1x32xf32, #tpu.memory_space<vmem>>, %arg9: memref<32x128xf32, #tpu.memory_space<vmem>>, %arg10: memref<1x128xf32, #tpu.memory_space<vmem>>, %arg11: memref<128x64xf32, #tpu.memory_space<vmem>>, %arg12: memref<1x64xf32, #tpu.memory_space<vmem>>, %arg13: memref<64x128xf32, #tpu.memory_space<vmem>>, %arg14: memref<1x128xf32, #tpu.memory_space<vmem>>, %arg15: memref<2x128xf32, #tpu.memory_space<vmem>>, %arg16: memref<2x136x128xf32, #tpu.memory_space<vmem>>, %arg17: memref<2x40x128xf32, #tpu.memory_space<vmem>>, %arg18: memref<2x32x64xf32, #tpu.memory_space<vmem>>) attributes {dimension_semantics = [], scalar_prefetch = 0 : i64, scratch_operands = 3 : i64, tpu.core_type = #tpu.core_type<tc>} {
    %cst = arith.constant 0.000000e+00 : f32
    %0 = vector.broadcast %cst : f32 to vector<2x8x128xf32>
    %c0 = arith.constant 0 : index
    %c128 = arith.constant 128 : index
    %c0_0 = arith.constant 0 : index
    %1 = vector.load %arg16[%c0, %c128, %c0_0] : memref<2x136x128xf32, #tpu.memory_space<vmem>>, vector<2x8x128xf32>
    tpu.vector_store %arg16[%c0, %c128, %c0_0], %0 {strides = array<i32>} : memref<2x136x128xf32, #tpu.memory_space<vmem>>, vector<2x8x128xf32>,
    %cst_1 = arith.constant 0.000000e+00 : f32
    %2 = vector.broadcast %cst_1 : f32 to vector<2x8x128xf32>
    %c0_2 = arith.constant 0 : index
    %c32 = arith.constant 32 : index
    %c0_3 = arith.constant 0 : index
    %3 = vector.load %arg17[%c0_2, %c32, %c0_3] : memref<2x40x128xf32, #tpu.memory_space<vmem>>, vector<2x8x128xf32>
    tpu.vector_store %arg17[%c0_2, %c32, %c0_3], %2 {strides = array<i32>} : memref<2x40x128xf32, #tpu.memory_space<vmem>>, vector<2x8x128xf32>,
    %cst_4 = arith.constant 0.000000e+00 : f32
    %4 = vector.broadcast %cst_4 : f32 to vector<2x24x64xf32>
    %c0_5 = arith.constant 0 : index
    %c8 = arith.constant 8 : index
    %c0_6 = arith.constant 0 : index
    %5 = vector.load %arg18[%c0_5, %c8, %c0_6] : memref<2x32x64xf32, #tpu.memory_space<vmem>>, vector<2x24x64xf32>
    tpu.vector_store %arg18[%c0_5, %c8, %c0_6], %4 {strides = array<i32>} : memref<2x32x64xf32, #tpu.memory_space<vmem>>, vector<2x24x64xf32>,
    %c0_7 = arith.constant 0 : index
    %c0_8 = arith.constant 0 : index
    %6 = vector.load %arg1[%c0_7, %c0_8] : memref<16x128xbf16, #tpu.memory_space<vmem>>, vector<16x128xbf16>
    %c0_9 = arith.constant 0 : index
    %c0_10 = arith.constant 0 : index
    %c0_11 = arith.constant 0 : index
    %c0_12 = arith.constant 0 : index
    %7 = vector.load %arg0[%c0_9, %c0_10, %c0_11, %c0_12] : memref<2x2x128x16xbf16, #tpu.memory_space<vmem>>, vector<1x2x32x16xbf16>
    %8 = vector.shape_cast %7 : vector<1x2x32x16xbf16> to vector<2x32x16xbf16>
    %9 = vector.shape_cast %8 : vector<2x32x16xbf16> to vector<64x16xbf16>
    %c1 = arith.constant 1 : index
    %c0_13 = arith.constant 0 : index
    %c0_14 = arith.constant 0 : index
    %c0_15 = arith.constant 0 : index
    %10 = vector.load %arg0[%c1, %c0_13, %c0_14, %c0_15] : memref<2x2x128x16xbf16, #tpu.memory_space<vmem>>, vector<1x2x32x16xbf16>
    %11 = vector.shape_cast %10 : vector<1x2x32x16xbf16> to vector<2x32x16xbf16>
    %12 = vector.shape_cast %11 : vector<2x32x16xbf16> to vector<64x16xbf16>
    %13 = tpu.concatenate %9, %12 in 0 : vector<64x16xbf16>, vector<64x16xbf16> -> vector<128x16xbf16>
    %cst_16 = arith.constant dense<0.000000e+00> : vector<128x128xf32>
    %14 = tpu.matmul %13, %6, %cst_16 {dimension_numbers = #tpu.dot_dimension_numbers<[1], [0], [0], [1], [0, 0, 1, 1], [], []>} : vector<128x16xbf16>, vector<16x128xbf16>, vector<128x128xf32> -> vector<128x128xf32>
    %15 = vector.extract_strided_slice %14 {offsets = [0, 0], sizes = [64, 128], strides = [1, 1]} : vector<128x128xf32> to vector<64x128xf32>
    %16 = vector.extract_strided_slice %14 {offsets = [64, 0], sizes = [64, 128], strides = [1, 1]} : vector<128x128xf32> to vector<64x128xf32>
    %17 = arith.maximumf %15, %16 : vector<64x128xf32>
    %c0_17 = arith.constant 0 : index
    %c0_18 = arith.constant 0 : index
    %18 = vector.load %arg2[%c0_17, %c0_18] : memref<1x128xf32, #tpu.memory_space<vmem>>, vector<1x128xf32>
    %19 = vector.broadcast %18 : vector<1x128xf32> to vector<64x128xf32>
    %20 = arith.addf %17, %19 : vector<64x128xf32>
    %cst_19 = arith.constant 0.000000e+00 : f32
    %21 = vector.broadcast %cst_19 : f32 to vector<64x128xf32>
    %22 = arith.maximumf %20, %21 : vector<64x128xf32>
    %23 = vector.shape_cast %22 : vector<64x128xf32> to vector<2x32x128xf32>
    %c0_20 = arith.constant 0 : index
    %c0_21 = arith.constant 0 : index
    %c0_22 = arith.constant 0 : index
    %24 = vector.load %arg16[%c0_20, %c0_21, %c0_22] : memref<2x136x128xf32, #tpu.memory_space<vmem>>, vector<2x32x128xf32>
    tpu.vector_store %arg16[%c0_20, %c0_21, %c0_22], %23 {strides = array<i32>} : memref<2x136x128xf32, #tpu.memory_space<vmem>>, vector<2x32x128xf32>,
    %c0_23 = arith.constant 0 : index
    %c0_24 = arith.constant 0 : index
    %c32_25 = arith.constant 32 : index
    %c0_26 = arith.constant 0 : index
    %25 = vector.load %arg0[%c0_23, %c0_24, %c32_25, %c0_26] : memref<2x2x128x16xbf16, #tpu.memory_space<vmem>>, vector<1x2x32x16xbf16>
    %26 = vector.shape_cast %25 : vector<1x2x32x16xbf16> to vector<2x32x16xbf16>
    %27 = vector.shape_cast %26 : vector<2x32x16xbf16> to vector<64x16xbf16>
    %c1_27 = arith.constant 1 : index
    %c0_28 = arith.constant 0 : index
    %c32_29 = arith.constant 32 : index
    %c0_30 = arith.constant 0 : index
    %28 = vector.load %arg0[%c1_27, %c0_28, %c32_29, %c0_30] : memref<2x2x128x16xbf16, #tpu.memory_space<vmem>>, vector<1x2x32x16xbf16>
    %29 = vector.shape_cast %28 : vector<1x2x32x16xbf16> to vector<2x32x16xbf16>
    %30 = vector.shape_cast %29 : vector<2x32x16xbf16> to vector<64x16xbf16>
    %31 = tpu.concatenate %27, %30 in 0 : vector<64x16xbf16>, vector<64x16xbf16> -> vector<128x16xbf16>
    %cst_31 = arith.constant dense<0.000000e+00> : vector<128x128xf32>
    %32 = tpu.matmul %31, %6, %cst_31 {dimension_numbers = #tpu.dot_dimension_numbers<[1], [0], [0], [1], [0, 0, 1, 1], [], []>} : vector<128x16xbf16>, vector<16x128xbf16>, vector<128x128xf32> -> vector<128x128xf32>
    %33 = vector.extract_strided_slice %32 {offsets = [0, 0], sizes = [64, 128], strides = [1, 1]} : vector<128x128xf32> to vector<64x128xf32>
    %34 = vector.extract_strided_slice %32 {offsets = [64, 0], sizes = [64, 128], strides = [1, 1]} : vector<128x128xf32> to vector<64x128xf32>
    %35 = arith.maximumf %33, %34 : vector<64x128xf32>
    %c0_32 = arith.constant 0 : index
    %c0_33 = arith.constant 0 : index
    %36 = vector.load %arg2[%c0_32, %c0_33] : memref<1x128xf32, #tpu.memory_space<vmem>>, vector<1x128xf32>
    %37 = vector.broadcast %36 : vector<1x128xf32> to vector<64x128xf32>
    %38 = arith.addf %35, %37 : vector<64x128xf32>
    %cst_34 = arith.constant 0.000000e+00 : f32
    %39 = vector.broadcast %cst_34 : f32 to vector<64x128xf32>
    %40 = arith.maximumf %38, %39 : vector<64x128xf32>
    %41 = vector.shape_cast %40 : vector<64x128xf32> to vector<2x32x128xf32>
    %c0_35 = arith.constant 0 : index
    %c32_36 = arith.constant 32 : index
    %c0_37 = arith.constant 0 : index
    %42 = vector.load %arg16[%c0_35, %c32_36, %c0_37] : memref<2x136x128xf32, #tpu.memory_space<vmem>>, vector<2x32x128xf32>
    tpu.vector_store %arg16[%c0_35, %c32_36, %c0_37], %41 {strides = array<i32>} : memref<2x136x128xf32, #tpu.memory_space<vmem>>, vector<2x32x128xf32>,
    %c0_38 = arith.constant 0 : index
    %c0_39 = arith.constant 0 : index
    %c64 = arith.constant 64 : index
    %c0_40 = arith.constant 0 : index
    %43 = vector.load %arg0[%c0_38, %c0_39, %c64, %c0_40] : memref<2x2x128x16xbf16, #tpu.memory_space<vmem>>, vector<1x2x32x16xbf16>
    %44 = vector.shape_cast %43 : vector<1x2x32x16xbf16> to vector<2x32x16xbf16>
    %45 = vector.shape_cast %44 : vector<2x32x16xbf16> to vector<64x16xbf16>
    %c1_41 = arith.constant 1 : index
    %c0_42 = arith.constant 0 : index
    %c64_43 = arith.constant 64 : index
    %c0_44 = arith.constant 0 : index
    %46 = vector.load %arg0[%c1_41, %c0_42, %c64_43, %c0_44] : memref<2x2x128x16xbf16, #tpu.memory_space<vmem>>, vector<1x2x32x16xbf16>
    %47 = vector.shape_cast %46 : vector<1x2x32x16xbf16> to vector<2x32x16xbf16>
    %48 = vector.shape_cast %47 : vector<2x32x16xbf16> to vector<64x16xbf16>
    %49 = tpu.concatenate %45, %48 in 0 : vector<64x16xbf16>, vector<64x16xbf16> -> vector<128x16xbf16>
    %cst_45 = arith.constant dense<0.000000e+00> : vector<128x128xf32>
    %50 = tpu.matmul %49, %6, %cst_45 {dimension_numbers = #tpu.dot_dimension_numbers<[1], [0], [0], [1], [0, 0, 1, 1], [], []>} : vector<128x16xbf16>, vector<16x128xbf16>, vector<128x128xf32> -> vector<128x128xf32>
    %51 = vector.extract_strided_slice %50 {offsets = [0, 0], sizes = [64, 128], strides = [1, 1]} : vector<128x128xf32> to vector<64x128xf32>
    %52 = vector.extract_strided_slice %50 {offsets = [64, 0], sizes = [64, 128], strides = [1, 1]} : vector<128x128xf32> to vector<64x128xf32>
    %53 = arith.maximumf %51, %52 : vector<64x128xf32>
    %c0_46 = arith.constant 0 : index
    %c0_47 = arith.constant 0 : index
    %54 = vector.load %arg2[%c0_46, %c0_47] : memref<1x128xf32, #tpu.memory_space<vmem>>, vector<1x128xf32>
    %55 = vector.broadcast %54 : vector<1x128xf32> to vector<64x128xf32>
    %56 = arith.addf %53, %55 : vector<64x128xf32>
    %cst_48 = arith.constant 0.000000e+00 : f32
    %57 = vector.broadcast %cst_48 : f32 to vector<64x128xf32>
    %58 = arith.maximumf %56, %57 : vector<64x128xf32>
    %59 = vector.shape_cast %58 : vector<64x128xf32> to vector<2x32x128xf32>
    %c0_49 = arith.constant 0 : index
    %c64_50 = arith.constant 64 : index
    %c0_51 = arith.constant 0 : index
    %60 = vector.load %arg16[%c0_49, %c64_50, %c0_51] : memref<2x136x128xf32, #tpu.memory_space<vmem>>, vector<2x32x128xf32>
    tpu.vector_store %arg16[%c0_49, %c64_50, %c0_51], %59 {strides = array<i32>} : memref<2x136x128xf32, #tpu.memory_space<vmem>>, vector<2x32x128xf32>,
    %c0_52 = arith.constant 0 : index
    %c0_53 = arith.constant 0 : index
    %c96 = arith.constant 96 : index
    %c0_54 = arith.constant 0 : index
    %61 = vector.load %arg0[%c0_52, %c0_53, %c96, %c0_54] : memref<2x2x128x16xbf16, #tpu.memory_space<vmem>>, vector<1x2x32x16xbf16>
    %62 = vector.shape_cast %61 : vector<1x2x32x16xbf16> to vector<2x32x16xbf16>
    %63 = vector.shape_cast %62 : vector<2x32x16xbf16> to vector<64x16xbf16>
    %c1_55 = arith.constant 1 : index
    %c0_56 = arith.constant 0 : index
    %c96_57 = arith.constant 96 : index
    %c0_58 = arith.constant 0 : index
    %64 = vector.load %arg0[%c1_55, %c0_56, %c96_57, %c0_58] : memref<2x2x128x16xbf16, #tpu.memory_space<vmem>>, vector<1x2x32x16xbf16>
    %65 = vector.shape_cast %64 : vector<1x2x32x16xbf16> to vector<2x32x16xbf16>
    %66 = vector.shape_cast %65 : vector<2x32x16xbf16> to vector<64x16xbf16>
    %67 = tpu.concatenate %63, %66 in 0 : vector<64x16xbf16>, vector<64x16xbf16> -> vector<128x16xbf16>
    %cst_59 = arith.constant dense<0.000000e+00> : vector<128x128xf32>
    %68 = tpu.matmul %67, %6, %cst_59 {dimension_numbers = #tpu.dot_dimension_numbers<[1], [0], [0], [1], [0, 0, 1, 1], [], []>} : vector<128x16xbf16>, vector<16x128xbf16>, vector<128x128xf32> -> vector<128x128xf32>
    %69 = vector.extract_strided_slice %68 {offsets = [0, 0], sizes = [64, 128], strides = [1, 1]} : vector<128x128xf32> to vector<64x128xf32>
    %70 = vector.extract_strided_slice %68 {offsets = [64, 0], sizes = [64, 128], strides = [1, 1]} : vector<128x128xf32> to vector<64x128xf32>
    %71 = arith.maximumf %69, %70 : vector<64x128xf32>
    %c0_60 = arith.constant 0 : index
    %c0_61 = arith.constant 0 : index
    %72 = vector.load %arg2[%c0_60, %c0_61] : memref<1x128xf32, #tpu.memory_space<vmem>>, vector<1x128xf32>
    %73 = vector.broadcast %72 : vector<1x128xf32> to vector<64x128xf32>
    %74 = arith.addf %71, %73 : vector<64x128xf32>
    %cst_62 = arith.constant 0.000000e+00 : f32
    %75 = vector.broadcast %cst_62 : f32 to vector<64x128xf32>
    %76 = arith.maximumf %74, %75 : vector<64x128xf32>
    %77 = vector.shape_cast %76 : vector<64x128xf32> to vector<2x32x128xf32>
    %c0_63 = arith.constant 0 : index
    %c96_64 = arith.constant 96 : index
    %c0_65 = arith.constant 0 : index
    %78 = vector.load %arg16[%c0_63, %c96_64, %c0_65] : memref<2x136x128xf32, #tpu.memory_space<vmem>>, vector<2x32x128xf32>
    tpu.vector_store %arg16[%c0_63, %c96_64, %c0_65], %77 {strides = array<i32>} : memref<2x136x128xf32, #tpu.memory_space<vmem>>, vector<2x32x128xf32>,
    %c0_66 = arith.constant 0 : index
    %c0_67 = arith.constant 0 : index
    %c0_68 = arith.constant 0 : index
    %79 = tpu.strided_load %arg16[%c0_66, %c0_67, %c0_68] {strides = array<i32: 1, 4, 1>} : memref<2x136x128xf32, #tpu.memory_space<vmem>>, vector<2x32x128xf32>
    %80 = vector.shape_cast %79 : vector<2x32x128xf32> to vector<64x128xf32>
    %81 = arith.truncf %80 : vector<64x128xf32> to vector<64x128xbf16>
    %c0_69 = arith.constant 0 : index
    %c1_70 = arith.constant 1 : index
    %c0_71 = arith.constant 0 : index
    %82 = tpu.strided_load %arg16[%c0_69, %c1_70, %c0_71] {strides = array<i32: 1, 4, 1>} : memref<2x136x128xf32, #tpu.memory_space<vmem>>, vector<2x32x128xf32>
    %83 = vector.shape_cast %82 : vector<2x32x128xf32> to vector<64x128xf32>
    %84 = arith.truncf %83 : vector<64x128xf32> to vector<64x128xbf16>
    %85 = tpu.concatenate %81, %84 in 1 : vector<64x128xbf16>, vector<64x128xbf16> -> vector<64x256xbf16>
    %c0_72 = arith.constant 0 : index
    %c2 = arith.constant 2 : index
    %c0_73 = arith.constant 0 : index
    %86 = tpu.strided_load %arg16[%c0_72, %c2, %c0_73] {strides = array<i32: 1, 4, 1>} : memref<2x136x128xf32, #tpu.memory_space<vmem>>, vector<2x32x128xf32>
    %87 = vector.shape_cast %86 : vector<2x32x128xf32> to vector<64x128xf32>
    %88 = arith.truncf %87 : vector<64x128xf32> to vector<64x128xbf16>
    %c0_74 = arith.constant 0 : index
    %c3 = arith.constant 3 : index
    %c0_75 = arith.constant 0 : index
    %89 = tpu.strided_load %arg16[%c0_74, %c3, %c0_75] {strides = array<i32: 1, 4, 1>} : memref<2x136x128xf32, #tpu.memory_space<vmem>>, vector<2x32x128xf32>
    %90 = vector.shape_cast %89 : vector<2x32x128xf32> to vector<64x128xf32>
    %91 = arith.truncf %90 : vector<64x128xf32> to vector<64x128xbf16>
    %92 = tpu.concatenate %88, %91 in 1 : vector<64x128xbf16>, vector<64x128xbf16> -> vector<64x256xbf16>
    %93 = tpu.concatenate %85, %92 in 0 : vector<64x256xbf16>, vector<64x256xbf16> -> vector<128x256xbf16>
    %c0_76 = arith.constant 0 : index
    %c0_77 = arith.constant 0 : index
    %94 = vector.load %arg3[%c0_76, %c0_77] : memref<640x128xbf16, #tpu.memory_space<vmem>>, vector<256x128xbf16>
    %cst_78 = arith.constant dense<0.000000e+00> : vector<128x128xf32>
    %95 = tpu.matmul %93, %94, %cst_78 {dimension_numbers = #tpu.dot_dimension_numbers<[1], [0], [0], [1], [0, 0, 1, 1], [], []>} : vector<128x256xbf16>, vector<256x128xbf16>, vector<128x128xf32> -> vector<128x128xf32>
    %c0_79 = arith.constant 0 : index
    %c2_80 = arith.constant 2 : index
    %c0_81 = arith.constant 0 : index
    %96 = tpu.strided_load %arg16[%c0_79, %c2_80, %c0_81] {strides = array<i32: 1, 4, 1>} : memref<2x136x128xf32, #tpu.memory_space<vmem>>, vector<2x32x128xf32>
    %97 = vector.shape_cast %96 : vector<2x32x128xf32> to vector<64x128xf32>
    %98 = arith.truncf %97 : vector<64x128xf32> to vector<64x128xbf16>
    %c0_82 = arith.constant 0 : index
    %c3_83 = arith.constant 3 : index
    %c0_84 = arith.constant 0 : index
    %99 = tpu.strided_load %arg16[%c0_82, %c3_83, %c0_84] {strides = array<i32: 1, 4, 1>} : memref<2x136x128xf32, #tpu.memory_space<vmem>>, vector<2x32x128xf32>
    %100 = vector.shape_cast %99 : vector<2x32x128xf32> to vector<64x128xf32>
    %101 = arith.truncf %100 : vector<64x128xf32> to vector<64x128xbf16>
    %102 = tpu.concatenate %98, %101 in 1 : vector<64x128xbf16>, vector<64x128xbf16> -> vector<64x256xbf16>
    %c0_85 = arith.constant 0 : index
    %c4 = arith.constant 4 : index
    %c0_86 = arith.constant 0 : index
    %103 = tpu.strided_load %arg16[%c0_85, %c4, %c0_86] {strides = array<i32: 1, 4, 1>} : memref<2x136x128xf32, #tpu.memory_space<vmem>>, vector<2x32x128xf32>
    %104 = vector.shape_cast %103 : vector<2x32x128xf32> to vector<64x128xf32>
    %105 = arith.truncf %104 : vector<64x128xf32> to vector<64x128xbf16>
    %c0_87 = arith.constant 0 : index
    %c5 = arith.constant 5 : index
    %c0_88 = arith.constant 0 : index
    %106 = tpu.strided_load %arg16[%c0_87, %c5, %c0_88] {strides = array<i32: 1, 4, 1>} : memref<2x136x128xf32, #tpu.memory_space<vmem>>, vector<2x32x128xf32>
    %107 = vector.shape_cast %106 : vector<2x32x128xf32> to vector<64x128xf32>
    %108 = arith.truncf %107 : vector<64x128xf32> to vector<64x128xbf16>
    %109 = tpu.concatenate %105, %108 in 1 : vector<64x128xbf16>, vector<64x128xbf16> -> vector<64x256xbf16>
    %110 = tpu.concatenate %102, %109 in 0 : vector<64x256xbf16>, vector<64x256xbf16> -> vector<128x256xbf16>
    %c256 = arith.constant 256 : index
    %c0_89 = arith.constant 0 : index
    %111 = vector.load %arg3[%c256, %c0_89] : memref<640x128xbf16, #tpu.memory_space<vmem>>, vector<256x128xbf16>
    %cst_90 = arith.constant dense<0.000000e+00> : vector<128x128xf32>
    %112 = tpu.matmul %110, %111, %cst_90 {dimension_numbers = #tpu.dot_dimension_numbers<[1], [0], [0], [1], [0, 0, 1, 1], [], []>} : vector<128x256xbf16>, vector<256x128xbf16>, vector<128x128xf32> -> vector<128x128xf32>
    %113 = arith.addf %95, %112 : vector<128x128xf32>
    %c0_91 = arith.constant 0 : index
    %c4_92 = arith.constant 4 : index
    %c0_93 = arith.constant 0 : index
    %114 = tpu.strided_load %arg16[%c0_91, %c4_92, %c0_93] {strides = array<i32: 1, 4, 1>} : memref<2x136x128xf32, #tpu.memory_space<vmem>>, vector<2x32x128xf32>
    %115 = vector.shape_cast %114 : vector<2x32x128xf32> to vector<64x128xf32>
    %116 = arith.truncf %115 : vector<64x128xf32> to vector<64x128xbf16>
    %c0_94 = arith.constant 0 : index
    %c6 = arith.constant 6 : index
    %c0_95 = arith.constant 0 : index
    %117 = tpu.strided_load %arg16[%c0_94, %c6, %c0_95] {strides = array<i32: 1, 4, 1>} : memref<2x136x128xf32, #tpu.memory_space<vmem>>, vector<2x32x128xf32>
    %118 = vector.shape_cast %117 : vector<2x32x128xf32> to vector<64x128xf32>
    %119 = arith.truncf %118 : vector<64x128xf32> to vector<64x128xbf16>
    %120 = tpu.concatenate %116, %119 in 0 : vector<64x128xbf16>, vector<64x128xbf16> -> vector<128x128xbf16>
    %c512 = arith.constant 512 : index
    %c0_96 = arith.constant 0 : index
    %121 = vector.load %arg3[%c512, %c0_96] : memref<640x128xbf16, #tpu.memory_space<vmem>>, vector<128x128xbf16>
    %cst_97 = arith.constant dense<0.000000e+00> : vector<128x128xf32>
    %122 = tpu.matmul %120, %121, %cst_97 {dimension_numbers = #tpu.dot_dimension_numbers<[1], [0], [0], [1], [0, 0, 1, 1], [], []>} : vector<128x128xbf16>, vector<128x128xbf16>, vector<128x128xf32> -> vector<128x128xf32>
    %123 = arith.addf %113, %122 : vector<128x128xf32>
    %124 = vector.extract_strided_slice %123 {offsets = [0, 0], sizes = [64, 128], strides = [1, 1]} : vector<128x128xf32> to vector<64x128xf32>
    %125 = vector.extract_strided_slice %123 {offsets = [64, 0], sizes = [64, 128], strides = [1, 1]} : vector<128x128xf32> to vector<64x128xf32>
    %126 = arith.maximumf %124, %125 : vector<64x128xf32>
    %c0_98 = arith.constant 0 : index
    %c0_99 = arith.constant 0 : index
    %127 = vector.load %arg4[%c0_98, %c0_99] : memref<1x128xf32, #tpu.memory_space<vmem>>, vector<1x128xf32>
    %128 = vector.broadcast %127 : vector<1x128xf32> to vector<64x128xf32>
    %129 = arith.addf %126, %128 : vector<64x128xf32>
    %cst_100 = arith.constant 0.000000e+00 : f32
    %130 = vector.broadcast %cst_100 : f32 to vector<64x128xf32>
    %131 = arith.maximumf %129, %130 : vector<64x128xf32>
    %132 = vector.shape_cast %131 : vector<64x128xf32> to vector<2x32x128xf32>
    %c0_101 = arith.constant 0 : index
    %c0_102 = arith.constant 0 : index
    %c0_103 = arith.constant 0 : index
    %133 = vector.load %arg17[%c0_101, %c0_102, %c0_103] : memref<2x40x128xf32, #tpu.memory_space<vmem>>, vector<2x32x128xf32>
    tpu.vector_store %arg17[%c0_101, %c0_102, %c0_103], %132 {strides = array<i32>} : memref<2x40x128xf32, #tpu.memory_space<vmem>>, vector<2x32x128xf32>,
    %c0_104 = arith.constant 0 : index
    %c0_105 = arith.constant 0 : index
    %c0_106 = arith.constant 0 : index
    %134 = tpu.strided_load %arg17[%c0_104, %c0_105, %c0_106] {strides = array<i32: 1, 4, 1>} : memref<2x40x128xf32, #tpu.memory_space<vmem>>, vector<2x8x128xf32>
    %135 = vector.shape_cast %134 : vector<2x8x128xf32> to vector<16x128xf32>
    %136 = arith.truncf %135 : vector<16x128xf32> to vector<16x128xbf16>
    %c0_107 = arith.constant 0 : index
    %c1_108 = arith.constant 1 : index
    %c0_109 = arith.constant 0 : index
    %137 = tpu.strided_load %arg17[%c0_107, %c1_108, %c0_109] {strides = array<i32: 1, 4, 1>} : memref<2x40x128xf32, #tpu.memory_space<vmem>>, vector<2x8x128xf32>
    %138 = vector.shape_cast %137 : vector<2x8x128xf32> to vector<16x128xf32>
    %139 = arith.truncf %138 : vector<16x128xf32> to vector<16x128xbf16>
    %140 = tpu.concatenate %136, %139 in 1 : vector<16x128xbf16>, vector<16x128xbf16> -> vector<16x256xbf16>
    %c0_110 = arith.constant 0 : index
    %c2_111 = arith.constant 2 : index
    %c0_112 = arith.constant 0 : index
    %141 = tpu.strided_load %arg17[%c0_110, %c2_111, %c0_112] {strides = array<i32: 1, 4, 1>} : memref<2x40x128xf32, #tpu.memory_space<vmem>>, vector<2x8x128xf32>
    %142 = vector.shape_cast %141 : vector<2x8x128xf32> to vector<16x128xf32>
    %143 = arith.truncf %142 : vector<16x128xf32> to vector<16x128xbf16>
    %c0_113 = arith.constant 0 : index
    %c3_114 = arith.constant 3 : index
    %c0_115 = arith.constant 0 : index
    %144 = tpu.strided_load %arg17[%c0_113, %c3_114, %c0_115] {strides = array<i32: 1, 4, 1>} : memref<2x40x128xf32, #tpu.memory_space<vmem>>, vector<2x8x128xf32>
    %145 = vector.shape_cast %144 : vector<2x8x128xf32> to vector<16x128xf32>
    %146 = arith.truncf %145 : vector<16x128xf32> to vector<16x128xbf16>
    %147 = tpu.concatenate %143, %146 in 1 : vector<16x128xbf16>, vector<16x128xbf16> -> vector<16x256xbf16>
    %148 = tpu.concatenate %140, %147 in 0 : vector<16x256xbf16>, vector<16x256xbf16> -> vector<32x256xbf16>
    %c0_116 = arith.constant 0 : index
    %c0_117 = arith.constant 0 : index
    %149 = vector.load %arg5[%c0_116, %c0_117] : memref<384x64xbf16, #tpu.memory_space<vmem>>, vector<256x64xbf16>
    %cst_118 = arith.constant dense<0.000000e+00> : vector<32x64xf32>
    %150 = tpu.matmul %148, %149, %cst_118 {dimension_numbers = #tpu.dot_dimension_numbers<[1], [0], [0], [1], [0, 0, 1, 1], [], []>} : vector<32x256xbf16>, vector<256x64xbf16>, vector<32x64xf32> -> vector<32x64xf32>
    %c0_119 = arith.constant 0 : index
    %c2_120 = arith.constant 2 : index
    %c0_121 = arith.constant 0 : index
    %151 = tpu.strided_load %arg17[%c0_119, %c2_120, %c0_121] {strides = array<i32: 1, 4, 1>} : memref<2x40x128xf32, #tpu.memory_space<vmem>>, vector<2x8x128xf32>
    %152 = vector.shape_cast %151 : vector<2x8x128xf32> to vector<16x128xf32>
    %153 = arith.truncf %152 : vector<16x128xf32> to vector<16x128xbf16>
    %c0_122 = arith.constant 0 : index
    %c4_123 = arith.constant 4 : index
    %c0_124 = arith.constant 0 : index
    %154 = tpu.strided_load %arg17[%c0_122, %c4_123, %c0_124] {strides = array<i32: 1, 4, 1>} : memref<2x40x128xf32, #tpu.memory_space<vmem>>, vector<2x8x128xf32>
    %155 = vector.shape_cast %154 : vector<2x8x128xf32> to vector<16x128xf32>
    %156 = arith.truncf %155 : vector<16x128xf32> to vector<16x128xbf16>
    %157 = tpu.concatenate %153, %156 in 0 : vector<16x128xbf16>, vector<16x128xbf16> -> vector<32x128xbf16>
    %c256_125 = arith.constant 256 : index
    %c0_126 = arith.constant 0 : index
    %158 = vector.load %arg5[%c256_125, %c0_126] : memref<384x64xbf16, #tpu.memory_space<vmem>>, vector<128x64xbf16>
    %cst_127 = arith.constant dense<0.000000e+00> : vector<32x64xf32>
    %159 = tpu.matmul %157, %158, %cst_127 {dimension_numbers = #tpu.dot_dimension_numbers<[1], [0], [0], [1], [0, 0, 1, 1], [], []>} : vector<32x128xbf16>, vector<128x64xbf16>, vector<32x64xf32> -> vector<32x64xf32>
    %160 = arith.addf %150, %159 : vector<32x64xf32>
    %161 = vector.extract_strided_slice %160 {offsets = [0, 0], sizes = [16, 64], strides = [1, 1]} : vector<32x64xf32> to vector<16x64xf32>
    %162 = vector.extract_strided_slice %160 {offsets = [16, 0], sizes = [16, 64], strides = [1, 1]} : vector<32x64xf32> to vector<16x64xf32>
    %163 = arith.maximumf %161, %162 : vector<16x64xf32>
    %c0_128 = arith.constant 0 : index
    %c0_129 = arith.constant 0 : index
    %164 = vector.load %arg6[%c0_128, %c0_129] : memref<1x64xf32, #tpu.memory_space<vmem>>, vector<1x64xf32>
    %165 = vector.broadcast %164 : vector<1x64xf32> to vector<16x64xf32>
    %166 = arith.addf %163, %165 : vector<16x64xf32>
    %cst_130 = arith.constant 0.000000e+00 : f32
    %167 = vector.broadcast %cst_130 : f32 to vector<16x64xf32>
    %168 = arith.maximumf %166, %167 : vector<16x64xf32>
    %169 = vector.shape_cast %168 : vector<16x64xf32> to vector<2x8x64xf32>
    %c0_131 = arith.constant 0 : index
    %c0_132 = arith.constant 0 : index
    %c0_133 = arith.constant 0 : index
    %170 = vector.load %arg18[%c0_131, %c0_132, %c0_133] : memref<2x32x64xf32, #tpu.memory_space<vmem>>, vector<2x8x64xf32>
    tpu.vector_store %arg18[%c0_131, %c0_132, %c0_133], %169 {strides = array<i32>} : memref<2x32x64xf32, #tpu.memory_space<vmem>>, vector<2x8x64xf32>,
    %c0_134 = arith.constant 0 : index
    %c0_135 = arith.constant 0 : index
    %c0_136 = arith.constant 0 : index
    %171 = tpu.strided_load %arg18[%c0_134, %c0_135, %c0_136] {strides = array<i32: 1, 4, 1>} : memref<2x32x64xf32, #tpu.memory_space<vmem>>, vector<2x8x64xf32>
    %172 = vector.shape_cast %171 : vector<2x8x64xf32> to vector<16x64xf32>
    %173 = arith.truncf %172 : vector<16x64xf32> to vector<16x64xbf16>
    %c0_137 = arith.constant 0 : index
    %c1_138 = arith.constant 1 : index
    %c0_139 = arith.constant 0 : index
    %174 = tpu.strided_load %arg18[%c0_137, %c1_138, %c0_139] {strides = array<i32: 1, 4, 1>} : memref<2x32x64xf32, #tpu.memory_space<vmem>>, vector<2x8x64xf32>
    %175 = vector.shape_cast %174 : vector<2x8x64xf32> to vector<16x64xf32>
    %176 = arith.truncf %175 : vector<16x64xf32> to vector<16x64xbf16>
    %177 = tpu.concatenate %173, %176 in 1 : vector<16x64xbf16>, vector<16x64xbf16> -> vector<16x128xbf16>
    %c0_140 = arith.constant 0 : index
    %c2_141 = arith.constant 2 : index
    %c0_142 = arith.constant 0 : index
    %178 = tpu.strided_load %arg18[%c0_140, %c2_141, %c0_142] {strides = array<i32: 1, 4, 1>} : memref<2x32x64xf32, #tpu.memory_space<vmem>>, vector<2x8x64xf32>
    %179 = vector.shape_cast %178 : vector<2x8x64xf32> to vector<16x64xf32>
    %180 = arith.truncf %179 : vector<16x64xf32> to vector<16x64xbf16>
    %c0_143 = arith.constant 0 : index
    %c3_144 = arith.constant 3 : index
    %c0_145 = arith.constant 0 : index
    %181 = tpu.strided_load %arg18[%c0_143, %c3_144, %c0_145] {strides = array<i32: 1, 4, 1>} : memref<2x32x64xf32, #tpu.memory_space<vmem>>, vector<2x8x64xf32>
    %182 = vector.shape_cast %181 : vector<2x8x64xf32> to vector<16x64xf32>
    %183 = arith.truncf %182 : vector<16x64xf32> to vector<16x64xbf16>
    %184 = tpu.concatenate %180, %183 in 1 : vector<16x64xbf16>, vector<16x64xbf16> -> vector<16x128xbf16>
    %185 = tpu.concatenate %177, %184 in 0 : vector<16x128xbf16>, vector<16x128xbf16> -> vector<32x128xbf16>
    %c0_146 = arith.constant 0 : index
    %c0_147 = arith.constant 0 : index
    %186 = vector.load %arg7[%c0_146, %c0_147] : memref<128x32xbf16, #tpu.memory_space<vmem>>, vector<128x32xbf16>
    %cst_148 = arith.constant dense<0.000000e+00> : vector<32x32xf32>
    %187 = tpu.matmul %185, %186, %cst_148 {dimension_numbers = #tpu.dot_dimension_numbers<[1], [0], [0], [1], [0, 0, 1, 1], [], []>} : vector<32x128xbf16>, vector<128x32xbf16>, vector<32x32xf32> -> vector<32x32xf32>
    %188 = vector.extract_strided_slice %187 {offsets = [0, 0], sizes = [16, 32], strides = [1, 1]} : vector<32x32xf32> to vector<16x32xf32>
    %189 = vector.extract_strided_slice %187 {offsets = [16, 0], sizes = [16, 32], strides = [1, 1]} : vector<32x32xf32> to vector<16x32xf32>
    %190 = arith.maximumf %188, %189 : vector<16x32xf32>
    %c0_149 = arith.constant 0 : index
    %c0_150 = arith.constant 0 : index
    %191 = vector.load %arg8[%c0_149, %c0_150] : memref<1x32xf32, #tpu.memory_space<vmem>>, vector<1x32xf32>
    %192 = vector.broadcast %191 : vector<1x32xf32> to vector<16x32xf32>
    %193 = arith.addf %190, %192 : vector<16x32xf32>
    %cst_151 = arith.constant 0.000000e+00 : f32
    %194 = vector.broadcast %cst_151 : f32 to vector<16x32xf32>
    %195 = arith.maximumf %193, %194 : vector<16x32xf32>
    %196 = vector.shape_cast %195 : vector<16x32xf32> to vector<2x8x32xf32>
    %197 = vector.extract_strided_slice %196 {offsets = [0, 0, 0], sizes = [2, 1, 32], strides = [1, 1, 1]} : vector<2x8x32xf32> to vector<2x1x32xf32>
    %cst_152 = arith.constant dense<0.000000e+00> : vector<2x32xf32>
    %198 = vector.multi_reduction <add>, %197, %cst_152 [1] : vector<2x1x32xf32> to vector<2x32xf32>
    %cst_153 = arith.constant 1.000000e+00 : f32
    %199 = vector.broadcast %cst_153 : f32 to vector<2x32xf32>
    %200 = arith.divf %198, %199 : vector<2x32xf32>
    %c0_154 = arith.constant 0 : index
    %c0_155 = arith.constant 0 : index
    %201 = vector.load %arg9[%c0_154, %c0_155] : memref<32x128xf32, #tpu.memory_space<vmem>>, vector<32x128xf32>
    %cst_156 = arith.constant dense<0.000000e+00> : vector<2x128xf32>
    %202 = tpu.matmul %200, %201, %cst_156 {dimension_numbers = #tpu.dot_dimension_numbers<[1], [0], [0], [1], [0, 0, 1, 1], [], []>} : vector<2x32xf32>, vector<32x128xf32>, vector<2x128xf32> -> vector<2x128xf32>
    %c0_157 = arith.constant 0 : index
    %c0_158 = arith.constant 0 : index
    %203 = vector.load %arg10[%c0_157, %c0_158] : memref<1x128xf32, #tpu.memory_space<vmem>>, vector<1x128xf32>
    %204 = vector.broadcast %203 : vector<1x128xf32> to vector<2x128xf32>
    %205 = arith.addf %202, %204 : vector<2x128xf32>
    %cst_159 = arith.constant 0.000000e+00 : f32
    %206 = vector.broadcast %cst_159 : f32 to vector<2x128xf32>
    %207 = arith.maximumf %205, %206 : vector<2x128xf32>
    %c0_160 = arith.constant 0 : index
    %c0_161 = arith.constant 0 : index
    %208 = vector.load %arg11[%c0_160, %c0_161] : memref<128x64xf32, #tpu.memory_space<vmem>>, vector<128x64xf32>
    %cst_162 = arith.constant dense<0.000000e+00> : vector<2x64xf32>
    %209 = tpu.matmul %207, %208, %cst_162 {dimension_numbers = #tpu.dot_dimension_numbers<[1], [0], [0], [1], [0, 0, 1, 1], [], []>} : vector<2x128xf32>, vector<128x64xf32>, vector<2x64xf32> -> vector<2x64xf32>
    %c0_163 = arith.constant 0 : index
    %c0_164 = arith.constant 0 : index
    %210 = vector.load %arg12[%c0_163, %c0_164] : memref<1x64xf32, #tpu.memory_space<vmem>>, vector<1x64xf32>
    %211 = vector.broadcast %210 : vector<1x64xf32> to vector<2x64xf32>
    %212 = arith.addf %209, %211 : vector<2x64xf32>
    %cst_165 = arith.constant 0.000000e+00 : f32
    %213 = vector.broadcast %cst_165 : f32 to vector<2x64xf32>
    %214 = arith.maximumf %212, %213 : vector<2x64xf32>
    %c0_166 = arith.constant 0 : index
    %c0_167 = arith.constant 0 : index
    %215 = vector.load %arg13[%c0_166, %c0_167] : memref<64x128xf32, #tpu.memory_space<vmem>>, vector<64x128xf32>
    %cst_168 = arith.constant dense<0.000000e+00> : vector<2x128xf32>
    %216 = tpu.matmul %214, %215, %cst_168 {dimension_numbers = #tpu.dot_dimension_numbers<[1], [0], [0], [1], [0, 0, 1, 1], [], []>} : vector<2x64xf32>, vector<64x128xf32>, vector<2x128xf32> -> vector<2x128xf32>
    %c0_169 = arith.constant 0 : index
    %c0_170 = arith.constant 0 : index
    %217 = vector.load %arg14[%c0_169, %c0_170] : memref<1x128xf32, #tpu.memory_space<vmem>>, vector<1x128xf32>
    %218 = vector.broadcast %217 : vector<1x128xf32> to vector<2x128xf32>
    %219 = arith.addf %216, %218 : vector<2x128xf32>
    %cst_171 = arith.constant 0.000000e+00 : f32
    %220 = vector.broadcast %cst_171 : f32 to vector<2x128xf32>
    %221 = arith.subf %220, %219 : vector<2x128xf32>
    %222 = math.exp %221 : vector<2x128xf32>
    %cst_172 = arith.constant 1.000000e+00 : f32
    %223 = vector.broadcast %cst_172 : f32 to vector<2x128xf32>
    %224 = arith.addf %223, %222 : vector<2x128xf32>
    %225 = tpu.reciprocal %224 {approx = true} : vector<2x128xf32> -> vector<2x128xf32>
    %c0_173 = arith.constant 0 : index
    %c0_174 = arith.constant 0 : index
    %226 = vector.load %arg15[%c0_173, %c0_174] : memref<2x128xf32, #tpu.memory_space<vmem>>, vector<2x128xf32>
    tpu.vector_store %arg15[%c0_173, %c0_174], %225 {strides = array<i32>} : memref<2x128xf32, #tpu.memory_space<vmem>>, vector<2x128xf32>,
    return
  }
}

</mosaic_0001>

<bundles_post_ra>
// kernel: detection_model_forward.1
= control target key start
LH: loop header
LB: loop body
LE: loop exit
PB: predicated region body
PF: predicated region fallthrough
CT: control target
= control target key end

     0   :  { %vm128_vm0 = vcmask 130048   ;;  %s4063_s0 = inlined_call_operand.vmem [shape: bf16[2,2,128,16], index: 0, kind: input, shape index: {}]   ;;  %s4064_s1 = inlined_call_operand.vmem [shape: bf16[16,128], index: 1, kind: input, shape index: {}]   ;;  %s4065_s2 = inlined_call_operand.vmem [shape: f32[1,128], index: 2, kind: input, shape index: {}]   ;;  %s4066_s3 = inlined_call_operand.vmem [shape: bf16[640,128], index: 3, kind: input, shape index: {}]   ;;  %s4067_s4 = inlined_call_operand.vmem [shape: f32[1,128], index: 4, kind: input, shape index: {}]   ;;  %s4068_s5 = inlined_call_operand.vmem [shape: bf16[384,64], index: 5, kind: input, shape index: {}]   ;;  %s4069_s6 = inlined_call_operand.vmem [shape: f32[1,64], index: 6, kind: input, shape index: {}]   ;;  %s4070_s7 = inlined_call_operand.vmem [shape: bf16[128,32], index: 7, kind: input, shape index: {}]   ;;  %s4071_s8 = inlined_call_operand.vmem [shape: f32[1,32], index: 8, kind: input, shape index: {}]   ;;  %s4072_s9 = inlined_call_operand.vmem [shape: f32[32,128], index: 9, kind: input, shape index: {}]   ;;  %s4073_s10 = inlined_call_operand.vmem [shape: f32[1,128], index: 10, kind: input, shape index: {}]   ;;  %s4074_s11 = inlined_call_operand.vmem [shape: f32[128,64], index: 11, kind: input, shape index: {}]   ;;  %s4075_s12 = inlined_call_operand.vmem [shape: f32[1,64], index: 12, kind: input, shape index: {}]   ;;  %s4076_s13 = inlined_call_operand.vmem [shape: f32[64,128], index: 13, kind: input, shape index: {}]   ;;  %s4077_s14 = inlined_call_operand.vmem [shape: f32[1,128], index: 14, kind: input, shape index: {}]   ;;  %s4078_s15 = inlined_call_operand.hbm [shape: f32[2,128], index: 15, kind: output, shape index: {}]  }
   0x1   :  { %v3220_v0 = vld [vmem:[%s4064_s1] sm:$0xff]   ;;  %v3222_v2 = vld [vmem:[%s4063_s0 + $0x10] sm:$0xff]   ;;  %v3223_v3 = vld [vmem:[%s4063_s0 + $0x8] sm:$0xff]  }
   0x2   :  { %v3221_v1 = vld [vmem:[%s4063_s0] sm:$0xff]   ;;  %2964 = vmatprep.subr.bf16.mxu0 %v3220_v0  ;;  %2982 = vmatprep.subr.bf16.mxu1 %v3220_v0  ;;  %v3224_v4 = vld [vmem:[%s4063_s0 + $0x18] sm:$0xff]   ;;  %v3226_v6 = vld [vmem:[%s4063_s0 + $0x50] sm:$0xff]  }
   0x3   :  { %2965 = vmatpush3.bf16.msra.mxu0 %v3220_v0  ;;  %2983 = vmatpush3.bf16.msra.mxu1 %v3220_v0  ;;  %v3225_v5 = vld [vmem:[%s4063_s0 + $0x40] sm:$0xff]   ;;  %v3227_v7 = vld [vmem:[%s4063_s0 + $0x48] sm:$0xff]   ;;  %v3228_v8 = vld [vmem:[%s4063_s0 + $0x58] sm:$0xff]  }
   0x4   :  { %2966 = vmatprep.mubr.msk.bf16.mxu0 %vm128_vm0, %v3221_v1  ;;  %2984 = vmatprep.mubr.msk.bf16.mxu1 %vm128_vm0, %v3222_v2  ;;  %v3229_v9 = vld [vmem:[%s4063_s0 + $0x80] sm:$0xff]   ;;  %v3230_v10 = vld [vmem:[%s4063_s0 + $0x90] sm:$0xff]   ;;  %v3231_v11 = vld [vmem:[%s4063_s0 + $0x88] sm:$0xff]  }
   0x5   :  { %3000 = vmatprep.subr.bf16.mxu0 %v3220_v0  ;;  %3018 = vmatprep.subr.bf16.mxu1 %v3220_v0  ;;  %v3232_v12 = vld [vmem:[%s4063_s0 + $0x98] sm:$0xff]   ;;  %v3233_v13 = vld [vmem:[%s4063_s0 + $0xc0] sm:$0xff]   ;;  %v3234_v14 = vld [vmem:[%s4063_s0 + $0xd0] sm:$0xff]  }
   0x6   :  { %2967 = vmatmul.mubr.msk.bf16.vlgmr.msra.gmra.mrb[0].mxu0 %vm128_vm0, %v3223_v3  ;;  %2985 = vmatmul.mubr.msk.bf16.vlgmr.msra.gmra.mrb[0].mxu1 %vm128_vm0, %v3224_v4  ;;  %v3235_v15 = vld [vmem:[%s4063_s0 + $0xc8] sm:$0xff]   ;;  %v3236_v16 = vld [vmem:[%s4063_s0 + $0xd8] sm:$0xff]   ;;  %v3237_v17 = vld [vmem:[%s4063_s0 + $0x20] sm:$0xff]  }
   0x7   :  { %3001 = vmatpush3.bf16.msra.mxu0 %v3220_v0  ;;  %3019 = vmatpush3.bf16.msra.mxu1 %v3220_v0  ;;  %v3238_v18 = vld [vmem:[%s4063_s0 + $0x30] sm:$0xff]   ;;  %v3239_v19 = vld [vmem:[%s4063_s0 + $0x28] sm:$0xff]   ;;  %v3240_v20 = vld [vmem:[%s4063_s0 + $0x38] sm:$0xff]  }
   0x8   :  { %2970 = vmatprep.mubr.msk.bf16.mxu0 %vm128_vm0, %v3225_v5  ;;  %2988 = vmatprep.mubr.msk.bf16.mxu1 %vm128_vm0, %v3226_v6  ;;  %v3241_v21 = vld [vmem:[%s4063_s0 + $0x60] sm:$0xff]   ;;  %v3242_v22 = vld [vmem:[%s4063_s0 + $0x70] sm:$0xff]   ;;  %v3243_v23 = vld [vmem:[%s4063_s0 + $0x68] sm:$0xff]  }
   0x9   :  { %v3244_v24 = vld [vmem:[%s4063_s0 + $0x78] sm:$0xff]   ;;  %v3245_v25 = vld [vmem:[%s4063_s0 + $0xa0] sm:$0xff]   ;;  %v3246_v26 = vld [vmem:[%s4063_s0 + $0xb0] sm:$0xff]  }
   0xa   :  { %v3247_v27 = vld [vmem:[%s4063_s0 + $0xa8] sm:$0xff]   ;;  %v3248_v28 = vld [vmem:[%s4063_s0 + $0xb8] sm:$0xff]   ;;  %v3249_v29 = vld [vmem:[%s4063_s0 + $0xe0] sm:$0xff]  }
   0xb   :  { %v3250_v30 = vld [vmem:[%s4063_s0 + $0xf0] sm:$0xff]   ;;  %v3251_v31 = vld [vmem:[%s4063_s0 + $0xe8] sm:$0xff]   ;;  %v3252_v32 = vld [vmem:[%s4063_s0 + $0xf8] sm:$0xff]  }
   0xe   :  { %2971 = vmatmul.mubr.msk.bf16.gmra.mrb[4].mxu0 %vm128_vm0, %v3227_v7  ;;  %2989 = vmatmul.mubr.msk.bf16.gmra.mrb[4].mxu1 %vm128_vm0, %v3228_v8 }
   0xf   :  { %2974 = vmatprep.mubr.msk.bf16.mxu0 %vm128_vm0, %v3229_v9  ;;  %2992 = vmatprep.mubr.msk.bf16.mxu1 %vm128_vm0, %v3230_v10 }
  0x16   :  { %2975 = vmatmul.mubr.msk.bf16.gmra.mrb[8].mxu0 %vm128_vm0, %v3231_v11  ;;  %2993 = vmatmul.mubr.msk.bf16.gmra.mrb[8].mxu1 %vm128_vm0, %v3232_v12 }
  0x17   :  { %2978 = vmatprep.mubr.msk.bf16.mxu0 %vm128_vm0, %v3233_v13  ;;  %2996 = vmatprep.mubr.msk.bf16.mxu1 %vm128_vm0, %v3234_v14 }
  0x1e   :  { %2979 = vmatmul.mubr.msk.bf16.gmra.mrb[12].mxu0 %vm128_vm0, %v3235_v15  ;;  %2997 = vmatmul.mubr.msk.bf16.gmra.mrb[12].mxu1 %vm128_vm0, %v3236_v16 }
  0x1f   :  { %3002 = vmatprep.mubr.msk.bf16.mxu0 %vm128_vm0, %v3237_v17  ;;  %3020 = vmatprep.mubr.msk.bf16.mxu1 %vm128_vm0, %v3238_v18 }
  0x26   :  { %3003 = vmatmul.mubr.msk.bf16.vlgmr.msra.gmra.mrb[16].mxu0 %vm128_vm0, %v3239_v19  ;;  %3021 = vmatmul.mubr.msk.bf16.vlgmr.msra.gmra.mrb[16].mxu1 %vm128_vm0, %v3240_v20 }
  0x27   :  { %3006 = vmatprep.mubr.msk.bf16.mxu0 %vm128_vm0, %v3241_v21  ;;  %3024 = vmatprep.mubr.msk.bf16.mxu1 %vm128_vm0, %v3242_v22 }
  0x2e   :  { %3007 = vmatmul.mubr.msk.bf16.gmra.mrb[20].mxu0 %vm128_vm0, %v3243_v23  ;;  %3025 = vmatmul.mubr.msk.bf16.gmra.mrb[20].mxu1 %vm128_vm0, %v3244_v24 }
  0x2f   :  { %3010 = vmatprep.mubr.msk.bf16.mxu0 %vm128_vm0, %v3245_v25  ;;  %3028 = vmatprep.mubr.msk.bf16.mxu1 %vm128_vm0, %v3246_v26 }
  0x36   :  { %3011 = vmatmul.mubr.msk.bf16.gmra.mrb[24].mxu0 %vm128_vm0, %v3247_v27  ;;  %3029 = vmatmul.mubr.msk.bf16.gmra.mrb[24].mxu1 %vm128_vm0, %v3248_v28 }
  0x37   :  { %3014 = vmatprep.mubr.msk.bf16.mxu0 %vm128_vm0, %v3249_v29  ;;  %3032 = vmatprep.mubr.msk.bf16.mxu1 %vm128_vm0, %v3250_v30 }
  0x3e   :  { %3015 = vmatmul.mubr.msk.bf16.gmra.mrb[28].mxu0 %vm128_vm0, %v3251_v31  ;;  %3033 = vmatmul.mubr.msk.bf16.gmra.mrb[28].mxu1 %vm128_vm0, %v3252_v32 }
  0x3f   :  { %20 = vsyncpa [#allocation6], 0  ;;  %v3253_v33 = vld [vmem:[%s4066_s3 + $0xc0] sm:$0xff]   ;;  %v3257_v37 = vld [vmem:[%s4066_s3 + $0xc8] sm:$0xff]   ;;  %v3354_v1 = vmov 0.0   ;;  %vm56_vm1 = vcmask 523264  }
  0x40   :  { %v3254_v34 = vld [vmem:[%s4066_s3 + $0x40] sm:$0xff]   ;;  %2741 = vmatprep.subr.bf16.mxu0 %v3253_v33  ;;  %v3258_v38 = vld [vmem:[%s4066_s3 + $0x48] sm:$0xff]   ;;  %v3261_v41 = vld [vmem:[%s4066_s3 + $0xd0] sm:$0xff]   ;;  %52 = vst [vmem:[#allocation2 + $0x80] sm:$0xff] %v3354_v1  ;;  %vm3357_vm2 = vmmov 0   ;;  %vm2246_vm3 = vcmask 1041409  }
  0x41   :  { %v3255_v35 = vld [vmem:[%s4066_s3 + $0x80] sm:$0xff]   ;;  %2805 = vmatprep.subr.bf16.mxu1 %v3254_v34  ;;  %v3259_v39 = vld [vmem:[%s4066_s3 + $0x88] sm:$0xff]   ;;  %v3262_v42 = vld [vmem:[%s4066_s3 + $0x50] sm:$0xff]   ;;  %53 = vst [vmem:[#allocation2 + $0x108] sm:$0xff] %v3354_v1  ;;  %vm2248_vm4 = vcmask 261120  }
  0x42   :  { %v3256_v36 = vld [vmem:[%s4066_s3] sm:$0xff]   ;;  %2742 = vmatpush3.bf16.msra.mxu0 %v3255_v35  ;;  %v3260_v40 = vld [vmem:[%s4066_s3 + $0x8] sm:$0xff]   ;;  %v3263_v43 = vld [vmem:[%s4066_s3 + $0x90] sm:$0xff]   ;;  %54 = vst [vmem:[#allocation3 + $0x20] sm:$0xff] %v3354_v1 }
  0x43   :  { %2806 = vmatpush3.bf16.msra.mxu1 %v3256_v36  ;;  %2743 = vmatprep.subr.bf16.mxu0 %v3257_v37  ;;  %v3264_v44 = vld [vmem:[%s4066_s3 + $0x10] sm:$0xff]   ;;  %v3265_v45 = vld [vmem:[%s4066_s3 + $0xd8] sm:$0xff]   ;;  %v3269_v49 = vld [vmem:[%s4066_s3 + $0xe0] sm:$0xff]   ;;  %55 = vst [vmem:[#allocation3 + $0x48] sm:$0xff] %v3354_v1 }
  0x44   :  { %2807 = vmatprep.subr.bf16.mxu1 %v3258_v38  ;;  %v3266_v46 = vld [vmem:[%s4066_s3 + $0x58] sm:$0xff]   ;;  %v3270_v50 = vld [vmem:[%s4066_s3 + $0x60] sm:$0xff]   ;;  %v3273_v53 = vld [vmem:[%s4066_s3 + $0xe8] sm:$0xff]  }
  0x45   :  { %v3267_v47 = vld [vmem:[%s4066_s3 + $0x98] sm:$0xff]   ;;  %v3271_v51 = vld [vmem:[%s4066_s3 + $0xa0] sm:$0xff]   ;;  %v3274_v54 = vld [vmem:[%s4066_s3 + $0x68] sm:$0xff]  }
  0x46   :  { %2744 = vmatpush3.bf16.msra.mxu0 %v3259_v39  ;;  %v3268_v48 = vld [vmem:[%s4066_s3 + $0x18] sm:$0xff]   ;;  %v3272_v52 = vld [vmem:[%s4066_s3 + $0x20] sm:$0xff]   ;;  %v3275_v55 = vld [vmem:[%s4066_s3 + $0xa8] sm:$0xff]  }
  0x47   :  { %2808 = vmatpush3.bf16.msra.mxu1 %v3260_v40  ;;  %2745 = vmatprep.subr.bf16.mxu0 %v3261_v41  ;;  %v3276_v56 = vld [vmem:[%s4066_s3 + $0x28] sm:$0xff]   ;;  %v3277_v57 = vld [vmem:[%s4066_s3 + $0xf0] sm:$0xff]   ;;  %v3281_v61 = vld [vmem:[%s4066_s3 + $0xf8] sm:$0xff]  }
  0x48   :  { %2809 = vmatprep.subr.bf16.mxu1 %v3262_v42  ;;  %v3278_v58 = vld [vmem:[%s4066_s3 + $0x70] sm:$0xff]   ;;  %v3282_v62 = vld [vmem:[%s4066_s3 + $0x78] sm:$0xff]   ;;  %v3669_v2 = vld [vmem:[%s4066_s3 + $0x100] sm:$0xff]  }
  0x49   :  { %v3279_v59 = vld [vmem:[%s4066_s3 + $0xb0] sm:$0xff]   ;;  %v3283_v63 = vld [vmem:[%s4066_s3 + $0xb8] sm:$0xff]   ;;  %v3687_v20 = vld [vmem:[%s4065_s2] ss:$0 sm:$0xff] }
  0x4a   :  { %2746 = vmatpush3.bf16.msra.mxu0 %v3263_v43  ;;  %v3280_v60 = vld [vmem:[%s4066_s3 + $0x30] sm:$0xff]   ;;  %v3284_v0 = vld [vmem:[%s4066_s3 + $0x38] sm:$0xff]  }
  0x4b   :  { %2810 = vmatpush3.bf16.msra.mxu1 %v3264_v44  ;;  %2747 = vmatprep.subr.bf16.mxu0 %v3265_v45 }
  0x4c   :  { %2811 = vmatprep.subr.bf16.mxu1 %v3266_v46 }
  0x4e   :  { %2748 = vmatpush3.bf16.msra.mxu0 %v3267_v47 }
  0x4f   :  { %2812 = vmatpush3.bf16.msra.mxu1 %v3268_v48  ;;  %2749 = vmatprep.subr.bf16.mxu0 %v3269_v49 }
  0x50   :  { %2813 = vmatprep.subr.bf16.mxu1 %v3270_v50 }
  0x52   :  { %2750 = vmatpush3.bf16.msra.mxu0 %v3271_v51 }
  0x53   :  { %2814 = vmatpush3.bf16.msra.mxu1 %v3272_v52  ;;  %2751 = vmatprep.subr.bf16.mxu0 %v3273_v53 }
  0x54   :  { %2815 = vmatprep.subr.bf16.mxu1 %v3274_v54 }
  0x56   :  { %2752 = vmatpush3.bf16.msra.mxu0 %v3275_v55 }
  0x57   :  { %2816 = vmatpush3.bf16.msra.mxu1 %v3276_v56  ;;  %2753 = vmatprep.subr.bf16.mxu0 %v3277_v57 }
  0x58   :  { %2817 = vmatprep.subr.bf16.mxu1 %v3278_v58 }
  0x5a   :  { %2754 = vmatpush3.bf16.msra.mxu0 %v3279_v59 }
  0x5b   :  { %2818 = vmatpush3.bf16.msra.mxu1 %v3280_v60  ;;  %2755 = vmatprep.subr.bf16.mxu0 %v3281_v61 }
  0x5c   :  { %2819 = vmatprep.subr.bf16.mxu1 %v3282_v62 }
  0x5e   :  { %2756 = vmatpush3.bf16.msra.mxu0 %v3283_v63 }
  0x5f   :  { %2820 = vmatpush3.bf16.msra.mxu1 %v3284_v0  ;;  %3036 = vmatprep.subr.bf16.mxu0 %v3669_v2 }
  0xd9   :  { %v2968_v3 = vpop.f32.mrb[0].mxu0  ;;  %v2986_v4 = vpop.f32.mrb[0].mxu1 }
  0xda   :  { %v187_v5 = vpop.f32.mrb[1].mxu0  ;;  %v403_v6 = vpop.f32.mrb[1].mxu1 }
  0xdb   :  { %v2969_v7 = vpop.f32.mrb[2].mxu0  ;;  %v2987_v8 = vpop.f32.mrb[2].mxu1 }
  0xdc   :  { %v190_v9 = vpop.f32.mrb[3].mxu0  ;;  %v406_v10 = vpop.f32.mrb[3].mxu1 }
  0xe1   :  { %v2972_v11 = vpop.f32.mrb[4].mxu0  ;;  %v2990_v12 = vpop.f32.mrb[4].mxu1 }
  0xe2   :  { %v3672_v13 = vpop.f32.mrb[5].mxu0  ;;  %v3674_v14 = vpop.f32.mrb[5].mxu1 }
  0xe3   :  { %v3676_v15 = vpop.f32.mrb[6].mxu0  ;;  %v3678_v16 = vpop.f32.mrb[6].mxu1 }
  0xe4   :  { %v3680_v17 = vpop.f32.mrb[7].mxu0  ;;  %v3682_v18 = vpop.f32.mrb[7].mxu1 }
  0xe9   :  { %v2976_v19 = vpop.f32.mrb[8].mxu0  ;;  %v2994_v21 = vpop.f32.mrb[8].mxu1 }
  0xea   :  { %v252_v22 = vmax.f32 %v2968_v3, %v2976_v19  ;;  %v468_v23 = vmax.f32 %v2986_v4, %v2994_v21  ;;  %v219_v24 = vpop.f32.mrb[9].mxu0  ;;  %v435_v25 = vpop.f32.mrb[9].mxu1 }
  0xeb   :  { %v250_v26 = vmax.f32 %v187_v5, %v219_v24  ;;  %v466_v27 = vmax.f32 %v403_v6, %v435_v25  ;;  %v2977_v28 = vpop.f32.mrb[10].mxu0  ;;  %v2995_v29 = vpop.f32.mrb[10].mxu1 }
  0xec   :  { %v267_v30 = vadd.f32 %v3687_v20, %v252_v22  ;;  %v483_v31 = vadd.f32 %v3687_v20, %v468_v23  ;;  %v253_v32 = vmax.f32 %v2969_v7, %v2977_v28  ;;  %v469_v33 = vmax.f32 %v2987_v8, %v2995_v29  ;;  %v222_v34 = vpop.f32.mrb[11].mxu0  ;;  %v438_v35 = vpop.f32.mrb[11].mxu1 }
  0xed   :  { %v265_v36 = vadd.f32 %v3687_v20, %v250_v26  ;;  %v481_v37 = vadd.f32 %v3687_v20, %v466_v27  ;;  %v251_v38 = vmax.f32 %v190_v9, %v222_v34  ;;  %v467_v39 = vmax.f32 %v406_v10, %v438_v35 }
  0xee   :  { %v275_v40 = vmax.f32 %v267_v30, 0.0  ;;  %v491_v41 = vmax.f32 %v483_v31, 0.0  ;;  %v268_v42 = vadd.f32 %v3687_v20, %v253_v32  ;;  %v484_v43 = vadd.f32 %v3687_v20, %v469_v33 }
  0xef   :  { %v273_v44 = vmax.f32 %v265_v36, 0.0  ;;  %v489_v45 = vmax.f32 %v481_v37, 0.0  ;;  %v266_v46 = vadd.f32 %v3687_v20, %v251_v38  ;;  %v482_v47 = vadd.f32 %v3687_v20, %v467_v39 }
  0xf0   :  { %283 = vst [vmem:[#allocation2 + $0x10] sm:$0xff] %v275_v40  ;;  %499 = vst [vmem:[#allocation2 + $0x30] sm:$0xff] %v491_v41  ;;  %v276_v48 = vmax.f32 %v268_v42, 0.0  ;;  %v492_v49 = vmax.f32 %v484_v43, 0.0  ;;  %v3286_v41 = vld [vmem:[%s4066_s3 + $0x108] sm:$0xff]  }
  0xf1   :  { %281 = vst [vmem:[#allocation2] sm:$0xff] %v273_v44  ;;  %497 = vst [vmem:[#allocation2 + $0x20] sm:$0xff] %v489_v45  ;;  %v274_v50 = vmax.f32 %v266_v46, 0.0  ;;  %v490_v51 = vmax.f32 %v482_v47, 0.0  ;;  %v2980_v52 = vpop.f32.mrb[12].mxu0  ;;  %v2998_v53 = vpop.f32.mrb[12].mxu1 }
  0xf2   :  { %284 = vst [vmem:[#allocation2 + $0x18] sm:$0xff] %v276_v48  ;;  %500 = vst [vmem:[#allocation2 + $0x38] sm:$0xff] %v492_v49  ;;  %v256_v54 = vmax.f32 %v2972_v11, %v2980_v52  ;;  %v472_v55 = vmax.f32 %v2990_v12, %v2998_v53  ;;  %v235_v56 = vpop.f32.mrb[13].mxu0  ;;  %v451_v57 = vpop.f32.mrb[13].mxu1  ;;  %v3287_v45 = vld [vmem:[%s4066_s3 + $0x110] sm:$0xff]  }
  0xf3   :  { %282 = vst [vmem:[#allocation2 + $0x8] sm:$0xff] %v274_v50  ;;  %498 = vst [vmem:[#allocation2 + $0x28] sm:$0xff] %v490_v51  ;;  %v254_v58 = vmax.f32 %v3672_v13, %v235_v56  ;;  %v470_v59 = vmax.f32 %v3674_v14, %v451_v57  ;;  %v2981_v60 = vpop.f32.mrb[14].mxu0  ;;  %v2999_v61 = vpop.f32.mrb[14].mxu1  ;;  %v3288_v51 = vld [vmem:[%s4066_s3 + $0x118] sm:$0xff]  }
  0xf4   :  { %v271_v62 = vadd.f32 %v3687_v20, %v256_v54  ;;  %v487_v63 = vadd.f32 %v3687_v20, %v472_v55  ;;  %v257_v0 = vmax.f32 %v3676_v15, %v2981_v60  ;;  %v473_v1 = vmax.f32 %v3678_v16, %v2999_v61  ;;  %v238_v3 = vpop.f32.mrb[15].mxu0  ;;  %v454_v4 = vpop.f32.mrb[15].mxu1  ;;  %v3289_v54 = vld [vmem:[%s4066_s3 + $0x120] sm:$0xff]  }
  0xf5   :  { %v269_v5 = vadd.f32 %v3687_v20, %v254_v58  ;;  %v485_v6 = vadd.f32 %v3687_v20, %v470_v59  ;;  %v255_v7 = vmax.f32 %v3680_v17, %v238_v3  ;;  %v471_v8 = vmax.f32 %v3682_v18, %v454_v4 }
  0xf6   :  { %v279_v9 = vmax.f32 %v271_v62, 0.0  ;;  %v495_v10 = vmax.f32 %v487_v63, 0.0  ;;  %v272_v11 = vadd.f32 %v3687_v20, %v257_v0  ;;  %v488_v12 = vadd.f32 %v3687_v20, %v473_v1 }
  0xf7   :  { %v277_v13 = vmax.f32 %v269_v5, 0.0  ;;  %v493_v14 = vmax.f32 %v485_v6, 0.0  ;;  %v270_v15 = vadd.f32 %v3687_v20, %v255_v7  ;;  %v486_v16 = vadd.f32 %v3687_v20, %v471_v8 }
  0xf8   :  { %287 = vst [vmem:[#allocation2 + $0x98] sm:$0xff] %v279_v9  ;;  %503 = vst [vmem:[#allocation2 + $0xb8] sm:$0xff] %v495_v10  ;;  %v280_v19 = vmax.f32 %v272_v11, 0.0  ;;  %v496_v21 = vmax.f32 %v488_v12, 0.0  ;;  %v3290_v10 = vld [vmem:[%s4066_s3 + $0x128] sm:$0xff]  }
  0xf9   :  { %285 = vst [vmem:[#allocation2 + $0x88] sm:$0xff] %v277_v13  ;;  %501 = vst [vmem:[#allocation2 + $0xa8] sm:$0xff] %v493_v14  ;;  %v278_v17 = vmax.f32 %v270_v15, 0.0  ;;  %v494_v18 = vmax.f32 %v486_v16, 0.0  ;;  %v3004_v22 = vpop.f32.mrb[16].mxu0  ;;  %v3022_v23 = vpop.f32.mrb[16].mxu1 }
  0xfa   :  { %288 = vst [vmem:[#allocation2 + $0xa0] sm:$0xff] %v280_v19  ;;  %504 = vst [vmem:[#allocation2 + $0xc0] sm:$0xff] %v496_v21  ;;  %v619_v24 = vpop.f32.mrb[17].mxu0  ;;  %v835_v25 = vpop.f32.mrb[17].mxu1  ;;  %v997_v26 = vld [vmem:[#allocation2 + $0x3] ss:$4 sm:$0xff] }
  0xfb   :  { %v999_v27 = vld [vmem:[#allocation2 + $0x23] ss:$4 sm:$0xff]  ;;  %286 = vst [vmem:[#allocation2 + $0x90] sm:$0xff] %v278_v17  ;;  %502 = vst [vmem:[#allocation2 + $0xb0] sm:$0xff] %v494_v18  ;;  %v3005_v28 = vpop.f32.mrb[18].mxu0  ;;  %v3023_v29 = vpop.f32.mrb[18].mxu1 }
  0xfc   :  { %v3711_v30 = vpack.c.bf16 %v999_v27, %v997_v26  ;;  %v957_v31 = vld [vmem:[#allocation2 + $0x1] ss:$4 sm:$0xff]  ;;  %v622_v33 = vpop.f32.mrb[19].mxu0  ;;  %v838_v34 = vpop.f32.mrb[19].mxu1  ;;  %v977_v36 = vld [vmem:[#allocation2 + $0x2] ss:$4 sm:$0xff] }
  0xfd   :  { %v959_v32 = vld [vmem:[#allocation2 + $0x21] ss:$4 sm:$0xff]  ;;  %v979_v37 = vld [vmem:[#allocation2 + $0x22] ss:$4 sm:$0xff]  ;;  %v937_v39 = vld [vmem:[#allocation2] ss:$4 sm:$0xff] }
  0xfe   :  { %v972_v35 = vpack.c.bf16 %v959_v32, %v957_v31  ;;  %1248 = vmatprep.mubr.bf16.mxu0 %v3711_v30  ;;  %v3714_v38 = vpack.c.bf16 %v979_v37, %v977_v36  ;;  %v939_v40 = vld [vmem:[#allocation2 + $0x20] ss:$4 sm:$0xff] }
  0xff   :  { %v952_v42 = vpack.c.bf16 %v939_v40, %v937_v39  ;;  %v3291_v26 = vld [vmem:[%s4066_s3 + $0x130] sm:$0xff]  }
 0x100   :  { %1441 = vmatprep.mubr.bf16.mxu1 %v972_v35  ;;  %1249 = vmatmul.mubr.bf16.vlgmr.msra.gmra.mrb[32].mxu0 %v3714_v38 }
 0x101   :  { %1442 = vmatmul.mubr.bf16.vlgmr.msra.gmra.mrb[32].mxu1 %v952_v42  ;;  %3037 = vmatpush3.bf16.msra.mxu0 %v3669_v2  ;;  %v3721_v43 = vpop.f32.mrb[20].mxu0  ;;  %v3723_v44 = vpop.f32.mrb[20].mxu1 }
 0x102   :  { %3038 = vmatprep.subr.bf16.mxu0 %v3286_v41  ;;  %v3728_v46 = vpop.f32.mrb[21].mxu0  ;;  %v3730_v47 = vpop.f32.mrb[21].mxu1 }
 0x103   :  { %v3732_v48 = vpop.f32.mrb[22].mxu0  ;;  %v3734_v49 = vpop.f32.mrb[22].mxu1 }
 0x104   :  { %v3736_v50 = vpop.f32.mrb[23].mxu0  ;;  %v3738_v2 = vpop.f32.mrb[23].mxu1 }
 0x105   :  { %3039 = vmatpush3.bf16.msra.mxu0 %v3286_v41 }
 0x106   :  { %3040 = vmatprep.subr.bf16.mxu0 %v3287_v45 }
 0x109   :  { %3041 = vmatpush3.bf16.msra.mxu0 %v3287_v45  ;;  %v3012_v52 = vpop.f32.mrb[24].mxu0  ;;  %v3030_v53 = vpop.f32.mrb[24].mxu1 }
 0x10a   :  { %3042 = vmatprep.subr.bf16.mxu0 %v3288_v51  ;;  %v684_v55 = vmax.f32 %v3004_v22, %v3012_v52  ;;  %v900_v56 = vmax.f32 %v3022_v23, %v3030_v53  ;;  %v651_v57 = vpop.f32.mrb[25].mxu0  ;;  %v867_v58 = vpop.f32.mrb[25].mxu1 }
 0x10b   :  { %v682_v59 = vmax.f32 %v619_v24, %v651_v57  ;;  %v898_v60 = vmax.f32 %v835_v25, %v867_v58  ;;  %v3013_v61 = vpop.f32.mrb[26].mxu0  ;;  %v3031_v62 = vpop.f32.mrb[26].mxu1  ;;  %v1005_v57 = vld [vmem:[#allocation2 + $0x8b] ss:$4 sm:$0xff] }
 0x10c   :  { %v699_v63 = vadd.f32 %v3687_v20, %v684_v55  ;;  %v915_v0 = vadd.f32 %v3687_v20, %v900_v56  ;;  %v685_v1 = vmax.f32 %v3005_v28, %v3013_v61  ;;  %v901_v3 = vmax.f32 %v3023_v29, %v3031_v62  ;;  %v654_v4 = vpop.f32.mrb[27].mxu0  ;;  %v870_v5 = vpop.f32.mrb[27].mxu1  ;;  %v1007_v58 = vld [vmem:[#allocation2 + $0xab] ss:$4 sm:$0xff]  ;;  %v965_v61 = vld [vmem:[#allocation2 + $0x89] ss:$4 sm:$0xff] }
 0x10d   :  { %3043 = vmatpush3.bf16.msra.mxu0 %v3288_v51  ;;  %v697_v6 = vadd.f32 %v3687_v20, %v682_v59  ;;  %v913_v7 = vadd.f32 %v3687_v20, %v898_v60  ;;  %v683_v8 = vmax.f32 %v622_v33, %v654_v4  ;;  %v899_v9 = vmax.f32 %v838_v34, %v870_v5  ;;  %v967_v62 = vld [vmem:[#allocation2 + $0xa9] ss:$4 sm:$0xff] }
 0x10e   :  { %3044 = vmatprep.subr.bf16.mxu0 %v3289_v54  ;;  %v707_v11 = vmax.f32 %v699_v63, 0.0  ;;  %v923_v12 = vmax.f32 %v915_v0, 0.0  ;;  %v700_v13 = vadd.f32 %v3687_v20, %v685_v1  ;;  %v916_v14 = vadd.f32 %v3687_v20, %v901_v3 }
 0x10f   :  { %v705_v15 = vmax.f32 %v697_v6, 0.0  ;;  %v921_v16 = vmax.f32 %v913_v7, 0.0  ;;  %v698_v19 = vadd.f32 %v3687_v20, %v683_v8  ;;  %v914_v21 = vadd.f32 %v3687_v20, %v899_v9 }
 0x110   :  { %715 = vst [vmem:[#allocation2 + $0x50] sm:$0xff] %v707_v11  ;;  %931 = vst [vmem:[#allocation2 + $0x70] sm:$0xff] %v923_v12  ;;  %v708_v17 = vmax.f32 %v700_v13, 0.0  ;;  %v924_v18 = vmax.f32 %v916_v14, 0.0  ;;  %v1014_v11 = vpack.c.bf16 %v1007_v58, %v1005_v57  ;;  %v974_v12 = vpack.c.bf16 %v967_v62, %v965_v61  ;;  %v985_v13 = vld [vmem:[#allocation2 + $0x8a] ss:$4 sm:$0xff] }
 0x111   :  { %3045 = vmatpush3.bf16.msra.mxu0 %v3289_v54  ;;  %713 = vst [vmem:[#allocation2 + $0x40] sm:$0xff] %v705_v15  ;;  %929 = vst [vmem:[#allocation2 + $0x60] sm:$0xff] %v921_v16  ;;  %v706_v22 = vmax.f32 %v698_v19, 0.0  ;;  %v922_v23 = vmax.f32 %v914_v21, 0.0  ;;  %v3016_v24 = vpop.f32.mrb[28].mxu0  ;;  %v3034_v25 = vpop.f32.mrb[28].mxu1 }
 0x112   :  { %3046 = vmatprep.subr.bf16.mxu0 %v3290_v10  ;;  %716 = vst [vmem:[#allocation2 + $0x58] sm:$0xff] %v708_v17  ;;  %932 = vst [vmem:[#allocation2 + $0x78] sm:$0xff] %v924_v18  ;;  %v688_v27 = vmax.f32 %v3721_v43, %v3016_v24  ;;  %v904_v28 = vmax.f32 %v3723_v44, %v3034_v25  ;;  %v667_v29 = vpop.f32.mrb[29].mxu0  ;;  %v883_v31 = vpop.f32.mrb[29].mxu1  ;;  %v987_v14 = vld [vmem:[#allocation2 + $0xaa] ss:$4 sm:$0xff] }
 0x113   :  { %714 = vst [vmem:[#allocation2 + $0x48] sm:$0xff] %v706_v22  ;;  %930 = vst [vmem:[#allocation2 + $0x68] sm:$0xff] %v922_v23  ;;  %v686_v32 = vmax.f32 %v3728_v46, %v667_v29  ;;  %v902_v33 = vmax.f32 %v3730_v47, %v883_v31  ;;  %v3017_v34 = vpop.f32.mrb[30].mxu0  ;;  %v3035_v35 = vpop.f32.mrb[30].mxu1  ;;  %v3292_v47 = vld [vmem:[%s4066_s3 + $0x138] sm:$0xff]   ;;  %v994_v22 = vpack.c.bf16 %v987_v14, %v985_v13 }
 0x114   :  { %v703_v36 = vadd.f32 %v3687_v20, %v688_v27  ;;  %v919_v37 = vadd.f32 %v3687_v20, %v904_v28  ;;  %v689_v39 = vmax.f32 %v3732_v48, %v3017_v34  ;;  %v905_v40 = vmax.f32 %v3734_v49, %v3035_v35  ;;  %v670_v41 = vpop.f32.mrb[31].mxu0  ;;  %v886_v42 = vpop.f32.mrb[31].mxu1  ;;  %v945_v15 = vld [vmem:[#allocation2 + $0x88] ss:$4 sm:$0xff]  ;;  %v1515_v62 = vld [vmem:[#allocation2 + $0x8e] ss:$4 sm:$0xff] }
 0x115   :  { %3047 = vmatpush3.bf16.msra.mxu0 %v3290_v10  ;;  %v701_v43 = vadd.f32 %v3687_v20, %v686_v32  ;;  %v917_v44 = vadd.f32 %v3687_v20, %v902_v33  ;;  %v687_v45 = vmax.f32 %v3736_v50, %v670_v41  ;;  %v903_v46 = vmax.f32 %v3738_v2, %v886_v42  ;;  %v947_v16 = vld [vmem:[#allocation2 + $0xa8] ss:$4 sm:$0xff]  ;;  %v1069_v33 = vld [vmem:[#allocation2 + $0x5] ss:$4 sm:$0xff] }
 0x116   :  { %3048 = vmatprep.subr.bf16.mxu0 %v3291_v26  ;;  %v711_v51 = vmax.f32 %v703_v36, 0.0  ;;  %v927_v48 = vmax.f32 %v919_v37, 0.0  ;;  %v704_v49 = vadd.f32 %v3687_v20, %v689_v39  ;;  %v920_v52 = vadd.f32 %v3687_v20, %v905_v40  ;;  %v1049_v40 = vld [vmem:[#allocation2 + $0x4] ss:$4 sm:$0xff] }
 0x117   :  { %v709_v53 = vmax.f32 %v701_v43, 0.0  ;;  %v925_v54 = vmax.f32 %v917_v44, 0.0  ;;  %v702_v55 = vadd.f32 %v3687_v20, %v687_v45  ;;  %v918_v56 = vadd.f32 %v3687_v20, %v903_v46  ;;  %v3304_v13 = vld [vmem:[%s4068_s5 + $0x58] sm:$0xff]  }
 0x118   :  { %719 = vst [vmem:[#allocation2 + $0xd8] sm:$0xff] %v711_v51  ;;  %935 = vst [vmem:[#allocation2 + $0xf8] sm:$0xff] %v927_v48  ;;  %v712_v50 = vmax.f32 %v704_v49, 0.0  ;;  %v928_v2 = vmax.f32 %v920_v52, 0.0  ;;  %v954_v23 = vpack.c.bf16 %v947_v16, %v945_v15  ;;  %v1071_v31 = vld [vmem:[#allocation2 + $0x25] ss:$4 sm:$0xff] }
 0x119   :  { %3049 = vmatpush3.bf16.msra.mxu0 %v3291_v26  ;;  %717 = vst [vmem:[#allocation2 + $0xc8] sm:$0xff] %v709_v53  ;;  %933 = vst [vmem:[#allocation2 + $0xe8] sm:$0xff] %v925_v54  ;;  %v710_v59 = vmax.f32 %v702_v55, 0.0  ;;  %v926_v60 = vmax.f32 %v918_v56, 0.0  ;;  %v1084_v35 = vpack.c.bf16 %v1071_v31, %v1069_v33  ;;  %v1051_v36 = vld [vmem:[#allocation2 + $0x24] ss:$4 sm:$0xff] }
 0x11a   :  { %3050 = vmatprep.subr.bf16.mxu0 %v3292_v47  ;;  %720 = vst [vmem:[#allocation2 + $0xe0] sm:$0xff] %v712_v50  ;;  %936 = vst [vmem:[#allocation2 + $0x100] sm:$0xff] %v928_v2  ;;  %v1001_v63 = vld [vmem:[#allocation2 + $0x43] ss:$4 sm:$0xff]  ;;  %v961_v1 = vld [vmem:[#allocation2 + $0x41] ss:$4 sm:$0xff]  ;;  %v1064_v41 = vpack.c.bf16 %v1051_v36, %v1049_v40 }
 0x11b   :  { %v1003_v0 = vld [vmem:[#allocation2 + $0x63] ss:$4 sm:$0xff]  ;;  %718 = vst [vmem:[#allocation2 + $0xd0] sm:$0xff] %v710_v59  ;;  %934 = vst [vmem:[#allocation2 + $0xf0] sm:$0xff] %v926_v60  ;;  %v963_v3 = vld [vmem:[#allocation2 + $0x61] ss:$4 sm:$0xff] }
 0x11c   :  { %v1013_v20 = vpack.c.bf16 %v1003_v0, %v1001_v63  ;;  %v981_v4 = vld [vmem:[#allocation2 + $0x42] ss:$4 sm:$0xff]  ;;  %v973_v6 = vpack.c.bf16 %v963_v3, %v961_v1  ;;  %v941_v8 = vld [vmem:[#allocation2 + $0x40] ss:$4 sm:$0xff]  ;;  %v1073_v37 = vld [vmem:[#allocation2 + $0x45] ss:$4 sm:$0xff] }
 0x11d   :  { %v983_v5 = vld [vmem:[#allocation2 + $0x62] ss:$4 sm:$0xff]  ;;  %v943_v9 = vld [vmem:[#allocation2 + $0x60] ss:$4 sm:$0xff]  ;;  %3051 = vmatpush3.bf16.msra.mxu0 %v3292_v47  ;;  %v1075_v39 = vld [vmem:[#allocation2 + $0x65] ss:$4 sm:$0xff] }
 0x11e   :  { %v993_v7 = vpack.c.bf16 %v983_v5, %v981_v4  ;;  %1256 = vmatprep.mubr.bf16.mxu0 %v1013_v20  ;;  %v953_v10 = vpack.c.bf16 %v943_v9, %v941_v8  ;;  %1449 = vmatprep.mubr.bf16.mxu1 %v973_v6  ;;  %v1085_v42 = vpack.c.bf16 %v1075_v39, %v1073_v37  ;;  %v1053_v43 = vld [vmem:[#allocation2 + $0x44] ss:$4 sm:$0xff]  ;;  %v1077_v47 = vld [vmem:[#allocation2 + $0x8d] ss:$4 sm:$0xff]  ;;  %v1509_v50 = vld [vmem:[#allocation2 + $0x26] ss:$4 sm:$0xff] }
 0x11f   :  { %v1055_v44 = vld [vmem:[#allocation2 + $0x64] ss:$4 sm:$0xff]  ;;  %v1507_v2 = vld [vmem:[#allocation2 + $0x6] ss:$4 sm:$0xff] }
 0x120   :  { %1257 = vmatmul.mubr.bf16.gmra.mrb[36].mxu0 %v993_v7  ;;  %1450 = vmatmul.mubr.bf16.gmra.mrb[36].mxu1 %v953_v10  ;;  %v1079_v45 = vld [vmem:[#allocation2 + $0xad] ss:$4 sm:$0xff]  ;;  %v1065_v46 = vpack.c.bf16 %v1055_v44, %v1053_v43  ;;  %v1057_v52 = vld [vmem:[#allocation2 + $0x8c] ss:$4 sm:$0xff]  ;;  %v1522_v57 = vpack.c.bf16 %v1509_v50, %v1507_v2  ;;  %v1511_v58 = vld [vmem:[#allocation2 + $0x46] ss:$4 sm:$0xff] }
 0x121   :  { %1264 = vmatprep.mubr.bf16.mxu0 %v1014_v11  ;;  %1457 = vmatprep.mubr.bf16.mxu1 %v974_v12  ;;  %v1086_v51 = vpack.c.bf16 %v1079_v45, %v1077_v47  ;;  %v1513_v59 = vld [vmem:[#allocation2 + $0x66] ss:$4 sm:$0xff] }
 0x122   :  { %v1009_v19 = vld [vmem:[#allocation2 + $0xcb] ss:$4 sm:$0xff]  ;;  %v969_v17 = vld [vmem:[#allocation2 + $0xc9] ss:$4 sm:$0xff]  ;;  %v989_v26 = vld [vmem:[#allocation2 + $0xca] ss:$4 sm:$0xff]  ;;  %v1523_v61 = vpack.c.bf16 %v1513_v59, %v1511_v58 }
 0x123   :  { %v1011_v21 = vld [vmem:[#allocation2 + $0xeb] ss:$4 sm:$0xff]  ;;  %v971_v18 = vld [vmem:[#allocation2 + $0xe9] ss:$4 sm:$0xff]  ;;  %v991_v27 = vld [vmem:[#allocation2 + $0xea] ss:$4 sm:$0xff] }
 0x124   :  { %v1015_v24 = vpack.c.bf16 %v1011_v21, %v1009_v19  ;;  %v975_v25 = vpack.c.bf16 %v971_v18, %v969_v17  ;;  %v949_v28 = vld [vmem:[#allocation2 + $0xc8] ss:$4 sm:$0xff]  ;;  %v995_v32 = vpack.c.bf16 %v991_v27, %v989_v26  ;;  %v1081_v48 = vld [vmem:[#allocation2 + $0xcd] ss:$4 sm:$0xff]  ;;  %v1517_v60 = vld [vmem:[#allocation2 + $0xae] ss:$4 sm:$0xff] }
 0x125   :  { %v951_v29 = vld [vmem:[#allocation2 + $0xe8] ss:$4 sm:$0xff]  ;;  %v1083_v49 = vld [vmem:[#allocation2 + $0xed] ss:$4 sm:$0xff]  ;;  %v1524_v63 = vpack.c.bf16 %v1517_v60, %v1515_v62  ;;  %v1519_v0 = vld [vmem:[#allocation2 + $0xce] ss:$4 sm:$0xff] }
 0x126   :  { %v955_v34 = vpack.c.bf16 %v951_v29, %v949_v28  ;;  %v1087_v54 = vpack.c.bf16 %v1083_v49, %v1081_v48  ;;  %v1063_v55 = vld [vmem:[#allocation2 + $0xec] ss:$4 sm:$0xff]  ;;  %v1521_v1 = vld [vmem:[#allocation2 + $0xee] ss:$4 sm:$0xff] }
 0x127   :  { %v3293_v3 = vld [vmem:[%s4068_s5 + $0x80] sm:$0xff]   ;;  %v3294_v4 = vld [vmem:[%s4068_s5 + $0x88] sm:$0xff]   ;;  %v3295_v5 = vld [vmem:[%s4068_s5 + $0x90] sm:$0xff]  }
 0x128   :  { %1265 = vmatmul.mubr.bf16.gmra.mrb[40].mxu0 %v994_v22  ;;  %1458 = vmatmul.mubr.bf16.gmra.mrb[40].mxu1 %v954_v23  ;;  %v3296_v6 = vld [vmem:[%s4068_s5 + $0x40] sm:$0xff]   ;;  %v3299_v8 = vld [vmem:[%s4068_s5 + $0x48] sm:$0xff]   ;;  %v3301_v10 = vld [vmem:[%s4068_s5 + $0x50] sm:$0xff]  }
 0x129   :  { %1272 = vmatprep.mubr.bf16.mxu0 %v1015_v24  ;;  %1465 = vmatprep.mubr.bf16.mxu1 %v975_v25  ;;  %v3300_v9 = vld [vmem:[%s4068_s5 + $0x8] sm:$0xff]   ;;  %v3302_v12 = vld [vmem:[%s4068_s5 + $0x10] sm:$0xff]   ;;  %v3305_v14 = vld [vmem:[%s4068_s5 + $0x18] sm:$0xff]  }
 0x12a   :  { %3068 = vmatprep.subr.bf16.mxu1 %v3293_v3  ;;  %2895 = vmatprep.subr.bf16.mxu0 %v3296_v6  ;;  %v3303_v15 = vld [vmem:[%s4068_s5 + $0xa0] sm:$0xff]   ;;  %v3308_v21 = vld [vmem:[%s4068_s5 + $0xa8] sm:$0xff]   ;;  %v3312_v23 = vld [vmem:[%s4068_s5 + $0x70] sm:$0xff]  }
 0x12b   :  { %3069 = vmatpush3.bf16.msra.mxu1 %v3293_v3  ;;  %v3306_v16 = vld [vmem:[%s4068_s5 + $0x60] sm:$0xff]   ;;  %v3309_v17 = vld [vmem:[%s4068_s5 + $0x68] sm:$0xff]   ;;  %v3314_v26 = vld [vmem:[%s4068_s5 + $0xb8] sm:$0xff]  }
 0x12c   :  { %3070 = vmatprep.subr.bf16.mxu1 %v3294_v4  ;;  %v3307_v19 = vld [vmem:[%s4068_s5 + $0x20] sm:$0xff]   ;;  %v3310_v18 = vld [vmem:[%s4068_s5 + $0x28] sm:$0xff]   ;;  %v3315_v27 = vld [vmem:[%s4068_s5 + $0x78] sm:$0xff]  }
 0x12d   :  { %v3316_v37 = vld [vmem:[%s4068_s5 + $0x38] sm:$0xff]  }
 0x12f   :  { %3071 = vmatpush3.bf16.msra.mxu1 %v3294_v4 }
 0x130   :  { %1273 = vmatmul.mubr.bf16.gmra.mrb[44].mxu0 %v995_v32  ;;  %1466 = vmatmul.mubr.bf16.gmra.mrb[44].mxu1 %v955_v34 }
 0x131   :  { %1280 = vmatprep.mubr.bf16.mxu0 %v1084_v35  ;;  %1473 = vmatprep.mubr.bf16.mxu1 %v3711_v30  ;;  %v1059_v30 = vld [vmem:[#allocation2 + $0xac] ss:$4 sm:$0xff] }
 0x132   :  { %v1066_v53 = vpack.c.bf16 %v1059_v30, %v1057_v52  ;;  %3072 = vmatprep.subr.bf16.mxu1 %v3295_v5 }
 0x133   :  { %3073 = vmatpush3.bf16.msra.mxu1 %v3295_v5 }
 0x138   :  { %1281 = vmatmul.mubr.bf16.gmra.mrb[48].mxu0 %v1064_v41  ;;  %1474 = vmatmul.mubr.bf16.gmra.mrb[48].mxu1 %v3714_v38  ;;  %v1061_v38 = vld [vmem:[#allocation2 + $0xcc] ss:$4 sm:$0xff] }
 0x139   :  { %1288 = vmatprep.mubr.bf16.mxu0 %v1085_v42  ;;  %1481 = vmatprep.mubr.bf16.mxu1 %v1013_v20  ;;  %v1067_v56 = vpack.c.bf16 %v1063_v55, %v1061_v38  ;;  %v1525_v20 = vpack.c.bf16 %v1521_v1, %v1519_v0 }
 0x140   :  { %1289 = vmatmul.mubr.bf16.gmra.mrb[52].mxu0 %v1065_v46  ;;  %1482 = vmatmul.mubr.bf16.gmra.mrb[52].mxu1 %v993_v7  ;;  %v3297_v7 = vld [vmem:[%s4068_s5] sm:$0xff]  }
 0x141   :  { %1296 = vmatprep.mubr.bf16.mxu0 %v1086_v51  ;;  %1489 = vmatprep.mubr.bf16.mxu1 %v1014_v11  ;;  %v3298_v11 = vld [vmem:[%s4068_s5 + $0x98] sm:$0xff]  }
 0x142   :  { %3074 = vmatprep.subr.bf16.mxu1 %v3298_v11 }
 0x143   :  { %3075 = vmatpush3.bf16.msra.mxu1 %v3298_v11 }
 0x144   :  { %3076 = vmatprep.subr.bf16.mxu1 %v3303_v15 }
 0x147   :  { %3077 = vmatpush3.bf16.msra.mxu1 %v3303_v15 }
 0x148   :  { %1297 = vmatmul.mubr.bf16.gmra.mrb[56].mxu0 %v1066_v53  ;;  %1490 = vmatmul.mubr.bf16.gmra.mrb[56].mxu1 %v994_v22  ;;  %v3311_v22 = vld [vmem:[%s4068_s5 + $0xb0] sm:$0xff]  }
 0x149   :  { %1304 = vmatprep.mubr.bf16.mxu0 %v1087_v54  ;;  %1497 = vmatprep.mubr.bf16.mxu1 %v1015_v24  ;;  %v3313_v24 = vld [vmem:[%s4068_s5 + $0x30] sm:$0xff]  }
 0x14a   :  { %3078 = vmatprep.subr.bf16.mxu1 %v3308_v21 }
 0x14b   :  { %3079 = vmatpush3.bf16.msra.mxu1 %v3308_v21 }
 0x14c   :  { %3080 = vmatprep.subr.bf16.mxu1 %v3311_v22 }
 0x14f   :  { %3081 = vmatpush3.bf16.msra.mxu1 %v3311_v22 }
 0x150   :  { %1305 = vmatmul.mubr.bf16.gmra.mrb[60].mxu0 %v1067_v56  ;;  %1498 = vmatmul.mubr.bf16.gmra.mrb[60].mxu1 %v995_v32 }
 0x151   :  { %3052 = vmatprep.mubr.bf16.mxu0 %v1064_v41  ;;  %3082 = vmatprep.subr.bf16.mxu1 %v3314_v26 }
 0x153   :  { %3083 = vmatpush3.bf16.msra.mxu1 %v3314_v26 }
 0x158   :  { %3053 = vmatmul.mubr.bf16.vlgmr.msra.gmra.mrb[64].mxu0 %v1065_v46 }
 0x159   :  { %3056 = vmatprep.mubr.bf16.mxu0 %v1066_v53  ;;  %2896 = vmatpush3.bf16.msra.mxu0 %v3297_v7 }
 0x15a   :  { %2897 = vmatprep.subr.bf16.mxu0 %v3299_v8 }
 0x15d   :  { %2898 = vmatpush3.bf16.msra.mxu0 %v3300_v9 }
 0x15e   :  { %2899 = vmatprep.subr.bf16.mxu0 %v3301_v10 }
 0x160   :  { %3057 = vmatmul.mubr.bf16.gmra.mrb[68].mxu0 %v1067_v56 }
 0x161   :  { %3060 = vmatprep.mubr.bf16.mxu0 %v1522_v57  ;;  %2900 = vmatpush3.bf16.msra.mxu0 %v3302_v12 }
 0x162   :  { %2901 = vmatprep.subr.bf16.mxu0 %v3304_v13 }
 0x165   :  { %2902 = vmatpush3.bf16.msra.mxu0 %v3305_v14 }
 0x166   :  { %2903 = vmatprep.subr.bf16.mxu0 %v3306_v16 }
 0x168   :  { %3061 = vmatmul.mubr.bf16.gmra.mrb[72].mxu0 %v1523_v61 }
 0x169   :  { %3064 = vmatprep.mubr.bf16.mxu0 %v1524_v63  ;;  %2904 = vmatpush3.bf16.msra.mxu0 %v3307_v19 }
 0x16a   :  { %2905 = vmatprep.subr.bf16.mxu0 %v3309_v17 }
 0x16d   :  { %2906 = vmatpush3.bf16.msra.mxu0 %v3310_v18 }
 0x16e   :  { %2907 = vmatprep.subr.bf16.mxu0 %v3312_v23 }
 0x170   :  { %3065 = vmatmul.mubr.bf16.gmra.mrb[76].mxu0 %v1525_v20 }
 0x171   :  { %2908 = vmatpush3.bf16.msra.mxu0 %v3313_v24 }
 0x172   :  { %2909 = vmatprep.subr.bf16.mxu0 %v3315_v27 }
 0x175   :  { %2910 = vmatpush3.bf16.msra.mxu0 %v3316_v37 }
 0x1d3   :  { %v2757_v25 = vpop.f32.mrb[32].mxu0 }
 0x1d4   :  { %v2821_v28 = vpop.f32.mrb[32].mxu1  ;;  %v2758_v29 = vpop.f32.mrb[33].mxu0 }
 0x1d5   :  { %v2759_v31 = vadd.f32 %v2758_v29, %v2757_v25  ;;  %v2822_v32 = vpop.f32.mrb[33].mxu1  ;;  %v2760_v33 = vpop.f32.mrb[34].mxu0 }
 0x1d6   :  { %v2823_v34 = vadd.f32 %v2822_v32, %v2821_v28  ;;  %v2824_v35 = vpop.f32.mrb[34].mxu1  ;;  %v2761_v36 = vpop.f32.mrb[35].mxu0 }
 0x1d7   :  { %v2762_v39 = vadd.f32 %v2761_v36, %v2760_v33  ;;  %v2825_v40 = vpop.f32.mrb[35].mxu1 }
 0x1d8   :  { %v2826_v41 = vadd.f32 %v2825_v40, %v2824_v35  ;;  %v3853_v42 = vadd.f32 %v2823_v34, %v2759_v31 }
 0x1da   :  { %v3855_v43 = vadd.f32 %v2826_v41, %v2762_v39 }
 0x1f3   :  { %v2763_v44 = vpop.f32.mrb[36].mxu0  ;;  %v2827_v45 = vpop.f32.mrb[36].mxu1 }
 0x1f4   :  { %v2764_v46 = vpop.f32.mrb[37].mxu0  ;;  %v2828_v51 = vpop.f32.mrb[37].mxu1 }
 0x1f5   :  { %v2765_v47 = vadd.f32 %v2764_v46, %v2763_v44  ;;  %v2766_v30 = vpop.f32.mrb[38].mxu0  ;;  %v2829_v48 = vadd.f32 %v2828_v51, %v2827_v45  ;;  %v2830_v49 = vpop.f32.mrb[38].mxu1 }
 0x1f6   :  { %v2767_v52 = vpop.f32.mrb[39].mxu0  ;;  %v2831_v54 = vpop.f32.mrb[39].mxu1 }
 0x1f7   :  { %v2768_v53 = vadd.f32 %v2767_v52, %v2766_v30  ;;  %v2832_v38 = vadd.f32 %v2831_v54, %v2830_v49  ;;  %v3857_v55 = vadd.f32 %v2829_v48, %v2765_v47 }
 0x1f9   :  { %v3859_v56 = vadd.f32 %v2832_v38, %v2768_v53 }
 0x1fb   :  { %v2769_v50 = vpop.f32.mrb[40].mxu0  ;;  %v2833_v2 = vpop.f32.mrb[40].mxu1 }
 0x1fc   :  { %v2770_v57 = vpop.f32.mrb[41].mxu0  ;;  %v2834_v59 = vpop.f32.mrb[41].mxu1 }
 0x1fd   :  { %v2771_v58 = vadd.f32 %v2770_v57, %v2769_v50  ;;  %v2772_v60 = vpop.f32.mrb[42].mxu0  ;;  %v2835_v61 = vadd.f32 %v2834_v59, %v2833_v2  ;;  %v2836_v62 = vpop.f32.mrb[42].mxu1 }
 0x1fe   :  { %v2773_v63 = vpop.f32.mrb[43].mxu0  ;;  %v2837_v1 = vpop.f32.mrb[43].mxu1 }
 0x1ff   :  { %v2774_v0 = vadd.f32 %v2773_v63, %v2772_v60  ;;  %v2838_v20 = vadd.f32 %v2837_v1, %v2836_v62  ;;  %v3861_v3 = vadd.f32 %v2835_v61, %v2771_v58 }
 0x201   :  { %v3863_v4 = vadd.f32 %v2838_v20, %v2774_v0 }
 0x203   :  { %v2775_v5 = vpop.f32.mrb[44].mxu0  ;;  %v2839_v6 = vpop.f32.mrb[44].mxu1 }
 0x204   :  { %v2776_v7 = vpop.f32.mrb[45].mxu0  ;;  %v2840_v9 = vpop.f32.mrb[45].mxu1 }
 0x205   :  { %v2777_v8 = vadd.f32 %v2776_v7, %v2775_v5  ;;  %v2778_v10 = vpop.f32.mrb[46].mxu0  ;;  %v2841_v11 = vadd.f32 %v2840_v9, %v2839_v6  ;;  %v2842_v12 = vpop.f32.mrb[46].mxu1 }
 0x206   :  { %v2779_v13 = vpop.f32.mrb[47].mxu0  ;;  %v2843_v15 = vpop.f32.mrb[47].mxu1 }
 0x207   :  { %v2780_v14 = vadd.f32 %v2779_v13, %v2778_v10  ;;  %v2844_v16 = vadd.f32 %v2843_v15, %v2842_v12  ;;  %v3865_v19 = vadd.f32 %v2841_v11, %v2777_v8 }
 0x209   :  { %v3867_v21 = vadd.f32 %v2844_v16, %v2780_v14 }
 0x20b   :  { %v2781_v17 = vpop.f32.mrb[48].mxu0  ;;  %v2845_v18 = vpop.f32.mrb[48].mxu1 }
 0x20c   :  { %v2782_v22 = vpop.f32.mrb[49].mxu0  ;;  %v2846_v24 = vpop.f32.mrb[49].mxu1 }
 0x20d   :  { %v2783_v23 = vadd.f32 %v2782_v22, %v2781_v17  ;;  %v2784_v25 = vpop.f32.mrb[50].mxu0  ;;  %v2847_v26 = vadd.f32 %v2846_v24, %v2845_v18  ;;  %v2848_v27 = vpop.f32.mrb[50].mxu1 }
 0x20e   :  { %v2785_v28 = vpop.f32.mrb[51].mxu0  ;;  %v2849_v31 = vpop.f32.mrb[51].mxu1 }
 0x20f   :  { %v2786_v29 = vadd.f32 %v2785_v28, %v2784_v25  ;;  %v2850_v32 = vadd.f32 %v2849_v31, %v2848_v27  ;;  %v3869_v33 = vadd.f32 %v2847_v26, %v2783_v23 }
 0x211   :  { %v3871_v34 = vadd.f32 %v2850_v32, %v2786_v29 }
 0x213   :  { %v2787_v35 = vpop.f32.mrb[52].mxu0  ;;  %v2851_v36 = vpop.f32.mrb[52].mxu1 }
 0x214   :  { %v2788_v37 = vpop.f32.mrb[53].mxu0  ;;  %v2852_v40 = vpop.f32.mrb[53].mxu1 }
 0x215   :  { %v2789_v39 = vadd.f32 %v2788_v37, %v2787_v35  ;;  %v2790_v41 = vpop.f32.mrb[54].mxu0  ;;  %v2853_v44 = vadd.f32 %v2852_v40, %v2851_v36  ;;  %v2854_v45 = vpop.f32.mrb[54].mxu1 }
 0x216   :  { %v2791_v46 = vpop.f32.mrb[55].mxu0  ;;  %v2855_v51 = vpop.f32.mrb[55].mxu1 }
 0x217   :  { %v2792_v47 = vadd.f32 %v2791_v46, %v2790_v41  ;;  %v2856_v30 = vadd.f32 %v2855_v51, %v2854_v45  ;;  %v1484_v48 = vadd.f32 %v2853_v44, %v2789_v39 }
 0x219   :  { %v1487_v49 = vadd.f32 %v2856_v30, %v2792_v47 }
 0x21b   :  { %v2793_v52 = vpop.f32.mrb[56].mxu0  ;;  %v2857_v53 = vpop.f32.mrb[56].mxu1 }
 0x21c   :  { %v2794_v54 = vpop.f32.mrb[57].mxu0  ;;  %v2858_v50 = vpop.f32.mrb[57].mxu1 }
 0x21d   :  { %v2795_v38 = vadd.f32 %v2794_v54, %v2793_v52  ;;  %v2796_v2 = vpop.f32.mrb[58].mxu0  ;;  %v2859_v57 = vadd.f32 %v2858_v50, %v2857_v53  ;;  %v2860_v58 = vpop.f32.mrb[58].mxu1 }
 0x21e   :  { %v2797_v59 = vpop.f32.mrb[59].mxu0  ;;  %v2861_v61 = vpop.f32.mrb[59].mxu1 }
 0x21f   :  { %v2798_v60 = vadd.f32 %v2797_v59, %v2796_v2  ;;  %v2862_v62 = vadd.f32 %v2861_v61, %v2860_v58  ;;  %v1492_v63 = vadd.f32 %v2859_v57, %v2795_v38 }
 0x221   :  { %v3873_v0 = vadd.f32 %v2862_v62, %v2798_v60 }
 0x223   :  { %v2799_v1 = vpop.f32.mrb[60].mxu0  ;;  %v2863_v20 = vpop.f32.mrb[60].mxu1 }
 0x224   :  { %v2800_v5 = vpop.f32.mrb[61].mxu0  ;;  %v2864_v7 = vpop.f32.mrb[61].mxu1 }
 0x225   :  { %v2801_v6 = vadd.f32 %v2800_v5, %v2799_v1  ;;  %v2802_v8 = vpop.f32.mrb[62].mxu0  ;;  %v2865_v9 = vadd.f32 %v2864_v7, %v2863_v20  ;;  %v2866_v10 = vpop.f32.mrb[62].mxu1 }
 0x226   :  { %v2803_v11 = vpop.f32.mrb[63].mxu0  ;;  %v2867_v13 = vpop.f32.mrb[63].mxu1 }
 0x227   :  { %v2804_v12 = vadd.f32 %v2803_v11, %v2802_v8  ;;  %v2868_v14 = vadd.f32 %v2867_v13, %v2866_v10  ;;  %v1500_v15 = vadd.f32 %v2865_v9, %v2801_v6 }
 0x229   :  { %v1503_v16 = vadd.f32 %v2868_v14, %v2804_v12 }
 0x22b   :  { %v3054_v17 = vpop.f32.mrb[64].mxu0 }
 0x22c   :  { %v1689_v18 = vadd.f32 %v3054_v17, %v3857_v55  ;;  %v1624_v22 = vpop.f32.mrb[65].mxu0 }
 0x22d   :  { %v1687_v23 = vadd.f32 %v1624_v22, %v3853_v42  ;;  %v3055_v24 = vpop.f32.mrb[66].mxu0 }
 0x22e   :  { %v1690_v25 = vadd.f32 %v3055_v24, %v3859_v56  ;;  %v1627_v26 = vpop.f32.mrb[67].mxu0  ;;  %v2665_v56 = vld [vmem:[%s4067_s4] ss:$0 sm:$0xff] }
 0x22f   :  { %v1688_v27 = vadd.f32 %v1627_v26, %v3855_v43 }
 0x233   :  { %v3058_v28 = vpop.f32.mrb[68].mxu0 }
 0x234   :  { %v1693_v29 = vadd.f32 %v3058_v28, %v3865_v19  ;;  %v1640_v31 = vpop.f32.mrb[69].mxu0  ;;  %v3889_v28 = vld [vmem:[#allocation2 + $0x80] sm:$0xff] }
 0x235   :  { %v1691_v32 = vadd.f32 %v1640_v31, %v3861_v3  ;;  %v3059_v35 = vpop.f32.mrb[70].mxu0  ;;  %57 = vst.msk [vmem:[#allocation4 + $0x8] sm:$0xff] %vm56_vm1, %v3889_v28  ;;  %58 = vst.msk [vmem:[#allocation4 + $0x10] sm:$0xff] %vm56_vm1, %v3889_v28  ;;  %v3318_v31 = vld [vmem:[%s4070_s7 + $0x8] sm:$0xff]  }
 0x236   :  { %v1694_v36 = vadd.f32 %v3059_v35, %v3867_v21  ;;  %v1643_v37 = vpop.f32.mrb[71].mxu0  ;;  %59 = vst.msk [vmem:[#allocation4 + $0x18] sm:$0xff] %vm56_vm1, %v3889_v28  ;;  %60 = vst.msk [vmem:[#allocation4 + $0x28] sm:$0xff] %vm56_vm1, %v3889_v28  ;;  %v3320_v35 = vld [vmem:[%s4070_s7 + $0x18] sm:$0xff]  }
 0x237   :  { %v1692_v55 = vadd.f32 %v1643_v37, %v3863_v4  ;;  %61 = vst.msk [vmem:[#allocation4 + $0x30] sm:$0xff] %vm56_vm1, %v3889_v28  ;;  %62 = vst.msk [vmem:[#allocation4 + $0x38] sm:$0xff] %vm56_vm1, %v3889_v28  ;;  %v3322_v37 = vld [vmem:[%s4070_s7 + $0x28] sm:$0xff]  }
 0x23b   :  { %v3062_v39 = vpop.f32.mrb[72].mxu0 }
 0x23c   :  { %v1697_v42 = vadd.f32 %v3062_v39, %v1484_v48  ;;  %v1656_v40 = vpop.f32.mrb[73].mxu0 }
 0x23d   :  { %v1695_v43 = vadd.f32 %v1656_v40, %v3869_v33  ;;  %v3063_v41 = vpop.f32.mrb[74].mxu0 }
 0x23e   :  { %v1705_v19 = vmax.f32 %v1689_v18, %v1697_v42  ;;  %v1698_v44 = vadd.f32 %v3063_v41, %v1487_v49  ;;  %v1659_v45 = vpop.f32.mrb[75].mxu0 }
 0x23f   :  { %v1703_v3 = vmax.f32 %v1687_v23, %v1695_v43  ;;  %v1696_v46 = vadd.f32 %v1659_v45, %v3871_v34 }
 0x240   :  { %v1720_v21 = vadd.f32 %v2665_v56, %v1705_v19  ;;  %v1706_v47 = vmax.f32 %v1690_v25, %v1698_v44 }
 0x241   :  { %v1718_v51 = vadd.f32 %v2665_v56, %v1703_v3  ;;  %v1704_v4 = vmax.f32 %v1688_v27, %v1696_v46 }
 0x242   :  { %v1728_v30 = vmax.f32 %v1720_v21, 0.0  ;;  %v1721_v48 = vadd.f32 %v2665_v56, %v1706_v47 }
 0x243   :  { %v1726_v52 = vmax.f32 %v1718_v51, 0.0  ;;  %v1719_v53 = vadd.f32 %v2665_v56, %v1704_v4  ;;  %v3066_v54 = vpop.f32.mrb[76].mxu0 }
 0x244   :  { %1736 = vst [vmem:[#allocation3 + $0x10] sm:$0xff] %v1728_v30  ;;  %v1729_v38 = vmax.f32 %v1721_v48, 0.0  ;;  %v1701_v50 = vadd.f32 %v3066_v54, %v1500_v15  ;;  %v1672_v33 = vpop.f32.mrb[77].mxu0  ;;  %v2690_v54 = vld [vmem:[%s4069_s6] ss:$0 sm:$0xff]  ;;  %s3355_s6 = smov 64  }
 0x245   :  { %1734 = vst [vmem:[#allocation3] sm:$0xff] %v1726_v52  ;;  %v1727_v2 = vmax.f32 %v1719_v53, 0.0  ;;  %v1699_v49 = vadd.f32 %v1672_v33, %v1492_v63  ;;  %v3067_v57 = vpop.f32.mrb[78].mxu0 }
 0x246   :  { %1737 = vst [vmem:[#allocation3 + $0x18] sm:$0xff] %v1729_v38  ;;  %v1709_v58 = vmax.f32 %v1693_v29, %v1701_v50  ;;  %v1702_v34 = vadd.f32 %v3067_v57, %v1503_v16  ;;  %v1675_v59 = vpop.f32.mrb[79].mxu0  ;;  %v3317_v29 = vld [vmem:[%s4070_s7] sm:$0xff]  }
 0x247   :  { %1735 = vst [vmem:[#allocation3 + $0x8] sm:$0xff] %v1727_v2  ;;  %v1707_v60 = vmax.f32 %v1691_v32, %v1699_v49  ;;  %v1700_v61 = vadd.f32 %v1675_v59, %v3873_v0  ;;  %3088 = vmatprep.subr.bf16.mxu1 %v3317_v29  ;;  %v3319_v32 = vld [vmem:[%s4070_s7 + $0x10] sm:$0xff]  }
 0x248   :  { %v1724_v62 = vadd.f32 %v2665_v56, %v1709_v58  ;;  %v1710_v1 = vmax.f32 %v1694_v36, %v1702_v34  ;;  %v3321_v36 = vld [vmem:[%s4070_s7 + $0x20] sm:$0xff]   ;;  %v3324_v58 = vld [vmem:[%s4070_s7 + $0x38] sm:$0xff]  }
 0x249   :  { %v1722_v20 = vadd.f32 %v2665_v56, %v1707_v60  ;;  %v1708_v5 = vmax.f32 %v1692_v55, %v1700_v61  ;;  %v3323_v55 = vld [vmem:[%s4070_s7 + $0x30] sm:$0xff]  }
 0x24a   :  { %v1732_v6 = vmax.f32 %v1724_v62, 0.0  ;;  %v1725_v7 = vadd.f32 %v2665_v56, %v1710_v1 }
 0x24b   :  { %v1730_v8 = vmax.f32 %v1722_v20, 0.0  ;;  %v1723_v9 = vadd.f32 %v2665_v56, %v1708_v5 }
 0x24c   :  { %1740 = vst [vmem:[#allocation3 + $0x38] sm:$0xff] %v1732_v6  ;;  %v1733_v10 = vmax.f32 %v1725_v7, 0.0 }
 0x24d   :  { %1738 = vst [vmem:[#allocation3 + $0x28] sm:$0xff] %v1730_v8  ;;  %v1731_v63 = vmax.f32 %v1723_v9, 0.0 }
 0x24e   :  { %1741 = vst [vmem:[#allocation3 + $0x40] sm:$0xff] %v1733_v10  ;;  %v1752_v11 = vld [vmem:[#allocation3 + $0x2] ss:$4 sm:$0xff]  ;;  %v1747_v12 = vld [vmem:[#allocation3 + $0x1] ss:$4 sm:$0xff] }
 0x24f   :  { %1739 = vst [vmem:[#allocation3 + $0x30] sm:$0xff] %v1731_v63  ;;  %v1794_v13 = vld [vmem:[#allocation3 + $0x4] ss:$4 sm:$0xff]  ;;  %v1757_v26 = vld [vmem:[#allocation3 + $0x3] ss:$4 sm:$0xff] }
 0x250   :  { %v1742_v22 = vld [vmem:[#allocation3] ss:$4 sm:$0xff] }
 0x256   :  { %v1754_v14 = vld [vmem:[#allocation3 + $0x2a] ss:$4 sm:$0xff]  ;;  %v1749_v15 = vld [vmem:[#allocation3 + $0x29] ss:$4 sm:$0xff]  ;;  %v1796_v0 = vld [vmem:[#allocation3 + $0x2c] ss:$4 sm:$0xff] }
 0x257   :  { %v1755_v16 = vpack.c.bf16 %v1754_v14, %v1752_v11  ;;  %v1750_v17 = vpack.c.bf16 %v1749_v15, %v1747_v12  ;;  %v1797_v18 = vpack.c.bf16 %v1796_v0, %v1794_v13  ;;  %v1744_v23 = vld [vmem:[#allocation3 + $0x28] ss:$4 sm:$0xff]  ;;  %v1759_v24 = vld [vmem:[#allocation3 + $0x2b] ss:$4 sm:$0xff] }
 0x258   :  { %v1745_v25 = vpack.c.bf16 %v1744_v23, %v1742_v22  ;;  %v1760_v27 = vpack.c.bf16 %v1759_v24, %v1757_v26  ;;  %v2232_v14 = vld [vmem:[%s4072_s9] sm:$0xff]  ;;  %v2233_v15 = vld [vmem:[%s4072_s9 + $0x8] sm:$0xff] }
 0x259   :  { %3084 = vmatprep.mubr.bf16.mxu1 %v1755_v16  ;;  %2039 = vmatprep.mubr.bf16.mxu0 %v1750_v17  ;;  %v3174_v0 = vpack.c.bf16 %v2233_v15, %v2232_v14  ;;  %v2234_v17 = vld [vmem:[%s4072_s9 + $0x10] sm:$0xff]  ;;  %v2322_v23 = vld [vmem:[%s4074_s11] sm:$0xff]  ;;  %v2323_v24 = vld [vmem:[%s4074_s11 + $0x8] sm:$0xff] }
 0x25a   :  { %3085 = vmatmul.mubr.bf16.vlgmr.msra.gmra.mrb[64].mxu1 %v1797_v18  ;;  %2040 = vmatmul.mubr.bf16.vlgmr.msra.gmra.mrb[80].mxu0 %v1745_v25  ;;  %v2235_v18 = vld [vmem:[%s4072_s9 + $0x18] sm:$0xff]  ;;  %v2324_v25 = vld [vmem:[%s4074_s11 + $0x10] sm:$0xff]  ;;  %v3180_v26 = vpack.c.bf16 %v2323_v24, %v2322_v23 }
 0x25b   :  { %2047 = vmatprep.mubr.bf16.mxu0 %v1760_v27  ;;  %3089 = vmatpush3.bf16.msra.mxu1 %v3317_v29  ;;  %v3177_v22 = vpack.c.bf16 %v2235_v18, %v2234_v17  ;;  %v2325_v27 = vld [vmem:[%s4074_s11 + $0x18] sm:$0xff] }
 0x25c   :  { %3090 = vmatprep.subr.bf16.mxu1 %v3318_v31  ;;  %v3183_v29 = vpack.c.bf16 %v2325_v27, %v2324_v25 }
 0x25f   :  { %3091 = vmatpush3.bf16.msra.mxu1 %v3318_v31  ;;  %v2326_v31 = vld [vmem:[%s4074_s11 + $0x20] sm:$0xff] }
 0x260   :  { %3092 = vmatprep.subr.bf16.mxu1 %v3319_v32 }
 0x262   :  { %2048 = vmatmul.mubr.bf16.gmra.mrb[84].mxu0 %v1755_v16  ;;  %v3356_v16 = vmov 0.0|0.0  }
 0x263   :  { %3093 = vmatpush3.bf16.msra.mxu1 %v3319_v32  ;;  %3179 = vmatprep.subr.bf16.mxu0 %v3356_v16  ;;  %v2327_v32 = vld [vmem:[%s4074_s11 + $0x28] sm:$0xff] }
 0x264   :  { %3094 = vmatprep.subr.bf16.mxu1 %v3320_v35  ;;  %3151 = vmatprep.mubr.msk.f32.mxu0 %vm3357_vm2, %v3889_v28 }
 0x265   :  { %3181 = vmatpush3.bf16.msra.mxu0 %v3180_v26 }
 0x266   :  { %3182 = vmatprep.subr.bf16.mxu0 %v3356_v16 }
 0x267   :  { %3095 = vmatpush3.bf16.msra.mxu1 %v3320_v35  ;;  %v3186_v35 = vpack.c.bf16 %v2327_v32, %v2326_v31 }
 0x268   :  { %3096 = vmatprep.subr.bf16.mxu1 %v3321_v36 }
 0x269   :  { %3184 = vmatpush3.bf16.msra.mxu0 %v3183_v29 }
 0x26a   :  { %3185 = vmatprep.subr.bf16.mxu0 %v3356_v16 }
 0x26b   :  { %3097 = vmatpush3.bf16.msra.mxu1 %v3321_v36  ;;  %v2328_v36 = vld [vmem:[%s4074_s11 + $0x30] sm:$0xff] }
 0x26c   :  { %3098 = vmatprep.subr.bf16.mxu1 %v3322_v37 }
 0x26d   :  { %3187 = vmatpush3.bf16.msra.mxu0 %v3186_v35 }
 0x26e   :  { %3188 = vmatprep.subr.bf16.mxu0 %v3356_v16 }
 0x26f   :  { %3099 = vmatpush3.bf16.msra.mxu1 %v3322_v37  ;;  %v2329_v37 = vld [vmem:[%s4074_s11 + $0x38] sm:$0xff] }
 0x270   :  { %3100 = vmatprep.subr.bf16.mxu1 %v3323_v55 }
 0x273   :  { %3101 = vmatpush3.bf16.msra.mxu1 %v3323_v55  ;;  %v3189_v55 = vpack.c.bf16 %v2329_v37, %v2328_v36 }
 0x274   :  { %3102 = vmatprep.subr.bf16.mxu1 %v3324_v58 }
 0x275   :  { %3190 = vmatpush3.bf16.msra.mxu0 %v3189_v55 }
 0x276   :  { %3191 = vmatprep.subr.bf16.mxu0 %v3356_v16 }
 0x277   :  { %3103 = vmatpush3.bf16.msra.mxu1 %v3324_v58  ;;  %v2417_v58 = vld [vmem:[%s4076_s13 + $0x8] sm:$0xff] }
 0x278   :  { %3173 = vmatprep.subr.bf16.mxu1 %v3356_v16 }
 0x32d   :  { %v3086_v39 = vpop.f32.mrb[64].mxu1  ;;  %v2911_v42 = vpop.f32.mrb[80].mxu0 }
 0x32e   :  { %v1896_v40 = vpop.f32.mrb[65].mxu1  ;;  %v2912_v56 = vpop.f32.mrb[81].mxu0 }
 0x32f   :  { %v2913_v43 = vadd.f32 %v2912_v56, %v2911_v42  ;;  %v3087_v41 = vpop.f32.mrb[66].mxu1  ;;  %v2914_v19 = vpop.f32.mrb[82].mxu0  ;;  %v2331_v42 = vld [vmem:[%s4074_s11 + $0x48] sm:$0xff]  ;;  %v2332_v56 = vld [vmem:[%s4074_s11 + $0x50] sm:$0xff] }
 0x330   :  { %v1899_v44 = vpop.f32.mrb[67].mxu1  ;;  %v2915_v45 = vpop.f32.mrb[83].mxu0 }
 0x331   :  { %v2042_v3 = vadd.f32 %v2913_v43, %v1896_v40  ;;  %v2916_v46 = vadd.f32 %v2915_v45, %v2914_v19  ;;  %v2333_v43 = vld [vmem:[%s4074_s11 + $0x58] sm:$0xff]  ;;  %v2334_v19 = vld [vmem:[%s4074_s11 + $0x60] sm:$0xff] }
 0x333   :  { %v2045_v21 = vadd.f32 %v2916_v46, %v1899_v44  ;;  %v2335_v44 = vld [vmem:[%s4074_s11 + $0x68] sm:$0xff] }
 0x334   :  { %v3198_v45 = vpack.c.bf16 %v2335_v44, %v2334_v19 }
 0x335   :  { %v2917_v47 = vpop.f32.mrb[84].mxu0 }
 0x336   :  { %v2918_v51 = vpop.f32.mrb[85].mxu0 }
 0x337   :  { %v2919_v4 = vadd.f32 %v2918_v51, %v2917_v47  ;;  %v2920_v30 = vpop.f32.mrb[86].mxu0  ;;  %v2699_v51 = vld [vmem:[%s4071_s8] ss:$0 sm:$0xff] }
 0x338   :  { %v2921_v48 = vpop.f32.mrb[87].mxu0 }
 0x339   :  { %v2050_v52 = vadd.f32 %v3086_v39, %v2919_v4  ;;  %v2922_v53 = vadd.f32 %v2921_v48, %v2920_v30  ;;  %v2330_v39 = vld [vmem:[%s4074_s11 + $0x40] sm:$0xff] }
 0x33a   :  { %v3192_v40 = vpack.c.bf16 %v2331_v42, %v2330_v39 }
 0x33b   :  { %v2056_v38 = vmax.f32 %v2042_v3, %v2050_v52  ;;  %v2053_v50 = vadd.f32 %v3087_v41, %v2922_v53  ;;  %v3195_v41 = vpack.c.bf16 %v2333_v43, %v2332_v56 }
 0x33c   :  { %3193 = vmatpush3.bf16.msra.mxu0 %v3192_v40 }
 0x33d   :  { %v2065_v33 = vadd.f32 %v2690_v54, %v2056_v38  ;;  %v2057_v2 = vmax.f32 %v2045_v21, %v2053_v50  ;;  %3194 = vmatprep.subr.bf16.mxu0 %v3356_v16 }
 0x33f   :  { %v2067_v49 = vmax.f32 %v2065_v33, 0.0  ;;  %v2066_v57 = vadd.f32 %v2690_v54, %v2057_v2  ;;  %v2336_v33 = vld [vmem:[%s4074_s11 + $0x70] sm:$0xff]  ;;  %v2337_v2 = vld [vmem:[%s4074_s11 + $0x78] sm:$0xff] }
 0x340   :  { %3196 = vmatpush3.bf16.msra.mxu0 %v3195_v41 }
 0x341   :  { %2069 = vst.msk [vmem:[#allocation4] sm:$0xff] %vm56_vm1, %v2067_v49  ;;  %v2068_v34 = vmax.f32 %v2066_v57, 0.0  ;;  %3197 = vmatprep.subr.bf16.mxu0 %v3356_v16  ;;  %v3201_v49 = vpack.c.bf16 %v2337_v2, %v2336_v33  ;;  %v2416_v57 = vld [vmem:[%s4076_s13] sm:$0xff] }
 0x343   :  { %2070 = vst.msk [vmem:[#allocation4 + $0x20] sm:$0xff] %vm56_vm1, %v2068_v34  ;;  %v3204_v34 = vpack.c.bf16 %v2417_v58, %v2416_v57 }
 0x344   :  { %3199 = vmatpush3.bf16.msra.mxu0 %v3198_v45 }
 0x345   :  { %3200 = vmatprep.subr.bf16.mxu0 %v3356_v16 }
 0x348   :  { %v2076_v59 = vld [vmem:[#allocation4 + $0x1] ss:$4 sm:$0xff]  ;;  %v2093_v1 = vld [vmem:[#allocation4 + $0x3] ss:$4 sm:$0xff]  ;;  %v2071_v6 = vld [vmem:[#allocation4] ss:$4 sm:$0xff]  ;;  %3202 = vmatpush3.bf16.msra.mxu0 %v3201_v49 }
 0x349   :  { %v2088_v63 = vld [vmem:[#allocation4 + $0x2] ss:$4 sm:$0xff] }
 0x34a   :  { %v2078_v60 = vld [vmem:[#allocation4 + $0x21] ss:$4 sm:$0xff]  ;;  %v2095_v62 = vld [vmem:[#allocation4 + $0x23] ss:$4 sm:$0xff]  ;;  %v2073_v5 = vld [vmem:[#allocation4 + $0x20] ss:$4 sm:$0xff] }
 0x34b   :  { %v2079_v61 = vpack.c.bf16 %v2078_v60, %v2076_v59  ;;  %v2096_v20 = vpack.c.bf16 %v2095_v62, %v2093_v1  ;;  %v2074_v7 = vpack.c.bf16 %v2073_v5, %v2071_v6  ;;  %v2090_v9 = vld [vmem:[#allocation4 + $0x22] ss:$4 sm:$0xff] }
 0x34c   :  { %v2091_v11 = vpack.c.bf16 %v2090_v9, %v2088_v63  ;;  %v2419_v59 = vld [vmem:[%s4076_s13 + $0x18] sm:$0xff]  ;;  %v2421_v62 = vld [vmem:[%s4076_s13 + $0x28] sm:$0xff]  ;;  %v2422_v9 = vld [vmem:[%s4076_s13 + $0x30] sm:$0xff] }
 0x34d   :  { %2081 = vrot.lane.b32.xlu0 %v2079_v61, %s3355_s6  ;;  %v2420_v61 = vld [vmem:[%s4076_s13 + $0x20] sm:$0xff] }
 0x34e   :  { %v3210_v1 = vpack.c.bf16 %v2421_v62, %v2420_v61 }
 0x351   :  { %2098 = vrot.lane.b32.xlu0 %v2096_v20, %s3355_s6  ;;  %v2700_v20 = vld [vmem:[%s4073_s10] ss:$0 sm:$0xff] }
 0x3bf   :  { %v2082_v8 = vpop.permute.xlu0 %2081 }
 0x3c0   :  { %v2085_v10 = vsel %vm56_vm1, %v2074_v7, %v2082_v8 }
 0x3c1   :  { %3104 = vmatprep.mubr.bf16.mxu1 %v2085_v10  ;;  %v2423_v10 = vld [vmem:[%s4076_s13 + $0x38] sm:$0xff] }
 0x3c2   :  { %v3213_v63 = vpack.c.bf16 %v2423_v10, %v2422_v9 }
 0x3c3   :  { %v2099_v12 = vpop.permute.xlu0 %2098 }
 0x3c4   :  { %v2102_v13 = vsel %vm56_vm1, %v2091_v11, %v2099_v12  ;;  %v2702_v11 = vld [vmem:[%s4075_s12] ss:$0 sm:$0xff]  ;;  %s3358_s12 = smov [#allocation5]  }
 0x3c5   :  { %3105 = vmatmul.mubr.bf16.vlgmr.msra.gmra.mrb[68].mxu1 %v2102_v13 }
 0x3c6   :  { %3175 = vmatpush3.bf16.msra.mxu1 %v3174_v0  ;;  %3116 = vmatprep.mubr.msk.f32.mxu1 %vm3357_vm2, %v3889_v28  ;;  %v2703_v0 = vld [vmem:[%s4077_s14] ss:$0 sm:$0xff] }
 0x3c7   :  { %3176 = vmatprep.subr.bf16.mxu1 %v3356_v16 }
 0x3ca   :  { %3178 = vmatpush3.bf16.msra.mxu1 %v3177_v22 }
 0x3cb   :  { %3203 = vmatprep.subr.bf16.mxu1 %v3356_v16 }
 0x498   :  { %v3106_v3 = vpop.f32.mrb[68].mxu1 }
 0x499   :  { %v2202_v46 = vpop.f32.mrb[69].mxu1 }
 0x49a   :  { %v2217_v21 = vmax.f32 %v2202_v46, %v3106_v3  ;;  %v3107_v47 = vpop.f32.mrb[70].mxu1 }
 0x49b   :  { %v2205_v4 = vpop.f32.mrb[71].mxu1 }
 0x49c   :  { %v2218_v30 = vmax.f32 %v2205_v4, %v3107_v47  ;;  %v2226_v48 = vadd.f32 %v2699_v51, %v2217_v21 }
 0x49e   :  { %v2227_v52 = vadd.f32 %v2699_v51, %v2218_v30  ;;  %v2228_v54 = vmax.f32 %v2226_v48, 0.0 }
 0x4a0   :  { %v2229_v53 = vmax.f32 %v2227_v52, 0.0 }
 0x4a2   :  { %v2245_v38 = vrot.slane %v2229_v53, 7 }
 0x4a4   :  { %v2247_v50 = vsel %vm2246_vm3, %v2245_v38, %v2228_v54 }
 0x4a5   :  { %3117 = vmatmul.mubr.msk.f32.vlgmr.msra.gmra.mrb[72].mxu1 %vm2248_vm4, %v2247_v50 }
 0x4a6   :  { %3170 = vmatprep.mubr.msk.f32.mxu1 %vm3357_vm2, %v3889_v28  ;;  %v2418_v28 = vld [vmem:[%s4076_s13 + $0x10] sm:$0xff]  ;;  %3205 = vmatpush3.bf16.msra.mxu1 %v3204_v34  ;;  %s2516_s13 = sshll.u32 %s3358_s12, 4  ;;  %s2517_s13 = int_to_ptr.vmem [resolvable:$true] %s2516_s13 }
 0x4a7   :  { %v3207_v60 = vpack.c.bf16 %v2419_v59, %v2418_v28  ;;  %3206 = vmatprep.subr.bf16.mxu1 %v3356_v16  ;;  %s3330_s9 = scalar_lea.vmem %s2517_s13, 32  ;;  %p3335_p1 = scmp.lt.s32.totalorder %s2517_s13, %s2517_s13 }
 0x4a8   :  { %p3331_p0 = scmp.ne.s32.totalorder %s2517_s13, %s3330_s9  ;;  %p3336_p2 = scmp.lt.s32.totalorder %s3330_s9, %s3330_s9 }
 0x4aa   :  { %3208 = vmatpush3.bf16.msra.mxu1 %v3207_v60  ;;  %p3337_p3 = por %p3336_p2, %p3335_p1 }
 0x4ab   :  { %3209 = vmatprep.subr.bf16.mxu1 %v3356_v16 }
 0x4ac   :  { %p3338_p4 = pnand %p3337_p3, %p3331_p0 }
 0x4ae   :  { %3211 = vmatpush3.bf16.msra.mxu1 %v3210_v1 }
 0x4af   :  { %3212 = vmatprep.subr.bf16.mxu1 %v3356_v16 }
 0x4b2   :  { %3214 = vmatpush3.bf16.msra.mxu1 %v3213_v63 }
 0x578   :  { %v2317_v5 = vpop.f32.mrb[72].mxu1 }
 0x579   :  { %v2318_v6 = vadd.f32 %v2700_v20, %v2317_v5  ;;  %v3118_v7 = vpop.f32.mrb[73].mxu1 }
 0x57b   :  { %v2321_v8 = vmax.f32 %v2318_v6, 0.0 }
 0x57d   :  { %3152 = vmatmul.mubr.f32.vlgmr.msra.gmra.mrb[88].mxu0 %v2321_v8 }
 0x650   :  { %v2411_v12 = vpop.f32.mrb[88].mxu0 }
 0x651   :  { %v2412_v13 = vadd.f32 %v2702_v11, %v2411_v12  ;;  %v3153_v14 = vpop.f32.mrb[89].mxu0 }
 0x653   :  { %v2415_v15 = vmax.f32 %v2412_v13, 0.0 }
 0x655   :  { %3171 = vmatmul.mubr.msk.f32.vlgmr.msra.gmra.mrb[74].mxu1 %vm56_vm1, %v2415_v15 }
 0x728   :  { %v2500_v16 = vpop.f32.mrb[74].mxu1 }
 0x729   :  { %v2501_v17 = vadd.f32 %v2703_v0, %v2500_v16  ;;  %v3172_v18 = vpop.f32.mrb[75].mxu1 }
 0x72b   :  { %v2504_v22 = vsub.f32 0.0, %v2501_v17 }
 0x72d   :  { %v2505_v23 = vmul.f32 1.442695, %v2504_v22 }
 0x72f   :  { %3325 = vpow2.f32 %v2505_v23 }
 0x739   :  { %v3326_v24 = vpop.eup %3325 }
 0x73a   :  { %v2507_v25 = vadd.f32 1.0, %v3326_v24 }
 0x73c   :  { %3327 = vrcp.f32 %v2507_v25 }
 0x746   :  { %v3328_v26 = vpop.eup %3327 }
 0x747   :  { %2509 = vst [vmem:[#allocation5] sm:$0x3] %v3328_v26 }
 0x748   :  { %3341 = shalt.err (!%p3338_p4)
}
 0x749   :  { %s3342_s16 = scalar_lea.hbm %s4078_s15, 32 }
 0x74a   :  { %p3343_p5 = scmp.ne.s32.totalorder %s4078_s15, %s3342_s16  ;;  %p3346_p6 = scmp.lt.u32.totalorder %s3342_s16, %s4078_s15 }
 0x74c   :  { %p3348_p7 = pnand %p3346_p6, %p3343_p5 }
 0x74e   :  { %3351 = shalt.err (!%p3348_p7)
}
 0x74f   :  { %2519 = dma.vmem_to_hbm [thread:$0]  %s2517_s13, 32, %s4078_s15, [#allocation6]  }
 0x750   :  { %3352 = dma.done.wait [#allocation6], 32  }
 0x751   :  { %3353 = vsyncadd [#allocation6], 4294967264 }
 0x752   :  { %2523 = vsyncpa [#allocation6], 1 }

</bundles_post_ra>
